<compile_context>
chip_gen: v6e
topology: v6e:2x2x1
jax: 0.10.0
libtpu: 0.0.40
codegen_flags: <defaults>
</compile_context>

<pallas_src>
import functools

import jax
import jax.numpy as jnp
from jax.experimental import pallas as pl
from jax.experimental.pallas import tpu as pltpu

_LANE = 128  # TPU lane width


def _round_up(n: int, m: int) -> int:
    return (n + m - 1) // m * m


def _mlp_kernel(*refs, num_layers: int):
    """Fused MLP kernel.

    refs layout:
      refs[0]                     : x tile (bf16)      (tb, in_p)
      refs[1 + 2*l], refs[2 + 2*l]: layer-l W (bf16), b (f32, shape (1, out_p))
      refs[-1]                    : output tile (f32)  (tb, out_p)
    Layers 0..num_layers-2 are Linear+ReLU, layer num_layers-1 is plain Linear.
    """
    x_ref = refs[0]
    out_ref = refs[-1]
    p = refs[1:-1]

    h = x_ref[...]  # bf16 activations feeding the MXU

    for l in range(num_layers - 1):
        w = p[2 * l][...]
        b = p[2 * l + 1][...]
        z = jnp.dot(h, w, preferred_element_type=jnp.float32) + b  # f32 accumulate
        h = jnp.maximum(z, 0.0).astype(jnp.bfloat16)               # ReLU, back to bf16

    w = p[2 * (num_layers - 1)][...]
    b = p[2 * (num_layers - 1) + 1][...]
    y = jnp.dot(h, w, preferred_element_type=jnp.float32) + b
    out_ref[...] = y.astype(out_ref.dtype)  # lane-dense (padded) store


def mlp_forward(x, params, *, tile_batch: int = 128):
    """Run the fused MLP Pallas kernel.

    x:      (B, input_size) float32
    params: list of (W, b) with W: (in, out), b: (out,);
            params[:-1] are Linear+ReLU blocks, params[-1] is the output Linear.
    """
    assert tile_batch > 0 and tile_batch % 8 == 0, "tile_batch must be a multiple of 8"
    B, in_features = x.shape
    num_layers = len(params)
    out_features = params[-1][0].shape[1]

    # ---- pad batch to tile_batch and every feature dim to a 128-lane multiple ----
    Bp = _round_up(B, tile_batch)
    dims = [in_features] + [w.shape[1] for (w, _) in params]
    pdims = [_round_up(d, _LANE) for d in dims]

    xp = jnp.zeros((Bp, pdims[0]), jnp.bfloat16)
    xp = xp.at[:B, :in_features].set(x.astype(jnp.bfloat16))

    flat_args = [xp]
    for l, (w, b) in enumerate(params):
        wp = jnp.zeros((pdims[l], pdims[l + 1]), jnp.bfloat16)
        wp = wp.at[: w.shape[0], : w.shape[1]].set(w.astype(jnp.bfloat16))
        bp = jnp.zeros((1, pdims[l + 1]), jnp.float32)
        bp = bp.at[0, : b.shape[0]].set(b.astype(jnp.float32))
        flat_args += [wp, bp]

    grid = (Bp // tile_batch,)
    out_pad = pdims[-1]
    out_spec = pl.BlockSpec((tile_batch, out_pad), lambda i: (i, 0))
    out_shape = jax.ShapeDtypeStruct((Bp, out_pad), jnp.float32)

    def make_in_specs(single_buffer_weights: bool):
        specs = [pl.BlockSpec((tile_batch, pdims[0]), lambda i: (i, 0))]
        extra = {"pipeline_mode": pl.Buffered(1)} if single_buffer_weights else {}
        for l in range(num_layers):
            # Weights/biases have a constant index map -> no double buffering needed.
            specs.append(pl.BlockSpec((pdims[l], pdims[l + 1]), lambda i: (0, 0), **extra))
            specs.append(pl.BlockSpec((1, pdims[l + 1]), lambda i: (0, 0), **extra))
        return specs

    # ---- VMEM budget: double-buffered x/out tiles + (conservatively 2x) params ----
    param_bytes = sum(int(a.size) * a.dtype.itemsize for a in flat_args[1:])
    tile_bytes = tile_batch * pdims[0] * 2 + tile_batch * out_pad * 4
    vmem_needed = 2 * tile_bytes + 2 * param_bytes + (1 << 20)
    vmem_limit = int(min(64 * 2**20, max(16 * 2**20, 2 * vmem_needed)))

    kernel = functools.partial(_mlp_kernel, num_layers=num_layers)

    def build(single_buffer_weights: bool):
        return pl.pallas_call(
            kernel,
            out_shape=out_shape,
            grid_spec=pltpu.PrefetchScalarGridSpec(
                num_scalar_prefetch=0,
                grid=grid,
                in_specs=make_in_specs(single_buffer_weights),
                out_specs=out_spec,
            ),
            compiler_params=pltpu.CompilerParams(
                dimension_semantics=("parallel",),
                vmem_limit_bytes=vmem_limit,
            ),
        )

    try:
        y = build(True)(*flat_args)
    except Exception:
        # Fallback: same kernel/specs with default (double) buffering of weights.
        y = build(False)(*flat_args)

    return y[:B, :out_features]


def init_mlp_params(key, input_size, hidden_size, hidden_layers, output_size=1):
    """Deterministic PyTorch-style init: U(-1/sqrt(fan_in), 1/sqrt(fan_in))."""
    if hidden_layers < 1:
        raise ValueError(f"hidden_layers must be at least 1, but it is {hidden_layers}")
    dims = [input_size] + [hidden_size] * hidden_layers + [output_size]
    params = []
    for fan_in, fan_out in zip(dims[:-1], dims[1:]):
        key, kw, kb = jax.random.split(key, 3)
        bound = 1.0 / jnp.sqrt(fan_in)
        w = jax.random.uniform(kw, (fan_in, fan_out), jnp.float32, -bound, bound)
        b = jax.random.uniform(kb, (fan_out,), jnp.float32, -bound, bound)
        params.append((w, b))
    return params


def mlp_reference_f32(x, params):
    """Pure-JAX f32 reference (matches the PyTorch module's math)."""
    h = x
    for (w, b) in params[:-1]:
        h = jnp.maximum(h @ w + b, 0.0)
    w, b = params[-1]
    return h @ w + b


def mlp_reference_bf16(x, params):
    """Pure-JAX reference mirroring the kernel numerics (bf16 operands, f32 acc)."""
    h = x.astype(jnp.bfloat16)
    for (w, b) in params[:-1]:
        z = jnp.dot(h, w.astype(jnp.bfloat16), preferred_element_type=jnp.float32) + b
        h = jnp.maximum(z, 0.0).astype(jnp.bfloat16)
    w, b = params[-1]
    return jnp.dot(h, w.astype(jnp.bfloat16), preferred_element_type=jnp.float32) + b


if __name__ == "__main__":
    key = jax.random.PRNGKey(0)
    kx, kp = jax.random.split(key)

    batch = 16
    input_size = 32
    hidden_size = 64
    hidden_layers = 3
    output_size = 1

    x = jax.random.normal(kx, (batch, input_size), jnp.float32)
    params = init_mlp_params(kp, input_size, hidden_size, hidden_layers, output_size)

    y = mlp_forward(x, params, tile_batch=128)
    y = jax.block_until_ready(y)
    assert y.shape == (batch, output_size)

    # Tight check vs. a reference with identical bf16/f32 numerics.
    y_bf16_ref = mlp_reference_bf16(x, params)
    assert jnp.allclose(y, y_bf16_ref, atol=1e-3, rtol=1e-3), "Pallas MLP mismatch (bf16 ref)"

    # Loose check vs. the full-f32 PyTorch-equivalent math (bf16 rounding tolerance).
    y_f32_ref = mlp_reference_f32(x, params)
    assert jnp.allclose(y, y_f32_ref, atol=5e-2, rtol=5e-2), "Pallas MLP mismatch (f32 ref)"

    print("KERNEL_OK")
</pallas_src>

<mosaic_0001>
module attributes {stable_mosaic.version = 11 : i64} {
  func.func @_mlp_kernel(%arg0: i32, %arg1: memref<128x128xbf16, #tpu.memory_space<vmem>>, %arg2: memref<128x128xbf16, #tpu.memory_space<vmem>>, %arg3: memref<1x128xf32, #tpu.memory_space<vmem>>, %arg4: memref<128x128xbf16, #tpu.memory_space<vmem>>, %arg5: memref<1x128xf32, #tpu.memory_space<vmem>>, %arg6: memref<128x128xbf16, #tpu.memory_space<vmem>>, %arg7: memref<1x128xf32, #tpu.memory_space<vmem>>, %arg8: memref<128x128xbf16, #tpu.memory_space<vmem>>, %arg9: memref<1x128xf32, #tpu.memory_space<vmem>>, %arg10: memref<128x128xf32, #tpu.memory_space<vmem>>) attributes {dimension_semantics = [#tpu.dimension_semantics<parallel>], iteration_bounds = array<i64: 1>, scalar_prefetch = 0 : i64, scratch_operands = 0 : i64, tpu.core_type = #tpu.core_type<tc>, window_params = [{transform_indices = @transform_0, window_bounds = array<i64: 128, 128>}, {pipeline_mode = #tpu.pipeline_mode<synchronous>, transform_indices = @transform_1, window_bounds = array<i64: 128, 128>}, {pipeline_mode = #tpu.pipeline_mode<synchronous>, transform_indices = @transform_2, window_bounds = array<i64: 1, 128>}, {pipeline_mode = #tpu.pipeline_mode<synchronous>, transform_indices = @transform_3, window_bounds = array<i64: 128, 128>}, {pipeline_mode = #tpu.pipeline_mode<synchronous>, transform_indices = @transform_4, window_bounds = array<i64: 1, 128>}, {pipeline_mode = #tpu.pipeline_mode<synchronous>, transform_indices = @transform_5, window_bounds = array<i64: 128, 128>}, {pipeline_mode = #tpu.pipeline_mode<synchronous>, transform_indices = @transform_6, window_bounds = array<i64: 1, 128>}, {pipeline_mode = #tpu.pipeline_mode<synchronous>, transform_indices = @transform_7, window_bounds = array<i64: 128, 128>}, {pipeline_mode = #tpu.pipeline_mode<synchronous>, transform_indices = @transform_8, window_bounds = array<i64: 1, 128>}, {transform_indices = @transform_9, window_bounds = array<i64: 128, 128>}]} {
    %c0 = arith.constant 0 : index
    %c0_0 = arith.constant 0 : index
    %0 = vector.load %arg1[%c0, %c0_0] : memref<128x128xbf16, #tpu.memory_space<vmem>>, vector<128x128xbf16>
    %c0_1 = arith.constant 0 : index
    %c0_2 = arith.constant 0 : index
    %1 = vector.load %arg2[%c0_1, %c0_2] : memref<128x128xbf16, #tpu.memory_space<vmem>>, vector<128x128xbf16>
    %c0_3 = arith.constant 0 : index
    %c0_4 = arith.constant 0 : index
    %2 = vector.load %arg3[%c0_3, %c0_4] : memref<1x128xf32, #tpu.memory_space<vmem>>, vector<1x128xf32>
    %cst = arith.constant dense<0.000000e+00> : vector<128x128xf32>
    %3 = tpu.matmul %0, %1, %cst {dimension_numbers = #tpu.dot_dimension_numbers<[1], [0], [0], [1], [0, 0, 1, 1], [], []>} : vector<128x128xbf16>, vector<128x128xbf16>, vector<128x128xf32> -> vector<128x128xf32>
    %4 = vector.broadcast %2 : vector<1x128xf32> to vector<128x128xf32>
    %5 = arith.addf %3, %4 : vector<128x128xf32>
    %cst_5 = arith.constant 0.000000e+00 : f32
    %6 = vector.broadcast %cst_5 : f32 to vector<128x128xf32>
    %7 = arith.maximumf %5, %6 : vector<128x128xf32>
    %8 = arith.truncf %7 : vector<128x128xf32> to vector<128x128xbf16>
    %c0_6 = arith.constant 0 : index
    %c0_7 = arith.constant 0 : index
    %9 = vector.load %arg4[%c0_6, %c0_7] : memref<128x128xbf16, #tpu.memory_space<vmem>>, vector<128x128xbf16>
    %c0_8 = arith.constant 0 : index
    %c0_9 = arith.constant 0 : index
    %10 = vector.load %arg5[%c0_8, %c0_9] : memref<1x128xf32, #tpu.memory_space<vmem>>, vector<1x128xf32>
    %cst_10 = arith.constant dense<0.000000e+00> : vector<128x128xf32>
    %11 = tpu.matmul %8, %9, %cst_10 {dimension_numbers = #tpu.dot_dimension_numbers<[1], [0], [0], [1], [0, 0, 1, 1], [], []>} : vector<128x128xbf16>, vector<128x128xbf16>, vector<128x128xf32> -> vector<128x128xf32>
    %12 = vector.broadcast %10 : vector<1x128xf32> to vector<128x128xf32>
    %13 = arith.addf %11, %12 : vector<128x128xf32>
    %cst_11 = arith.constant 0.000000e+00 : f32
    %14 = vector.broadcast %cst_11 : f32 to vector<128x128xf32>
    %15 = arith.maximumf %13, %14 : vector<128x128xf32>
    %16 = arith.truncf %15 : vector<128x128xf32> to vector<128x128xbf16>
    %c0_12 = arith.constant 0 : index
    %c0_13 = arith.constant 0 : index
    %17 = vector.load %arg6[%c0_12, %c0_13] : memref<128x128xbf16, #tpu.memory_space<vmem>>, vector<128x128xbf16>
    %c0_14 = arith.constant 0 : index
    %c0_15 = arith.constant 0 : index
    %18 = vector.load %arg7[%c0_14, %c0_15] : memref<1x128xf32, #tpu.memory_space<vmem>>, vector<1x128xf32>
    %cst_16 = arith.constant dense<0.000000e+00> : vector<128x128xf32>
    %19 = tpu.matmul %16, %17, %cst_16 {dimension_numbers = #tpu.dot_dimension_numbers<[1], [0], [0], [1], [0, 0, 1, 1], [], []>} : vector<128x128xbf16>, vector<128x128xbf16>, vector<128x128xf32> -> vector<128x128xf32>
    %20 = vector.broadcast %18 : vector<1x128xf32> to vector<128x128xf32>
    %21 = arith.addf %19, %20 : vector<128x128xf32>
    %cst_17 = arith.constant 0.000000e+00 : f32
    %22 = vector.broadcast %cst_17 : f32 to vector<128x128xf32>
    %23 = arith.maximumf %21, %22 : vector<128x128xf32>
    %24 = arith.truncf %23 : vector<128x128xf32> to vector<128x128xbf16>
    %c0_18 = arith.constant 0 : index
    %c0_19 = arith.constant 0 : index
    %25 = vector.load %arg8[%c0_18, %c0_19] : memref<128x128xbf16, #tpu.memory_space<vmem>>, vector<128x128xbf16>
    %c0_20 = arith.constant 0 : index
    %c0_21 = arith.constant 0 : index
    %26 = vector.load %arg9[%c0_20, %c0_21] : memref<1x128xf32, #tpu.memory_space<vmem>>, vector<1x128xf32>
    %cst_22 = arith.constant dense<0.000000e+00> : vector<128x128xf32>
    %27 = tpu.matmul %24, %25, %cst_22 {dimension_numbers = #tpu.dot_dimension_numbers<[1], [0], [0], [1], [0, 0, 1, 1], [], []>} : vector<128x128xbf16>, vector<128x128xbf16>, vector<128x128xf32> -> vector<128x128xf32>
    %28 = vector.broadcast %26 : vector<1x128xf32> to vector<128x128xf32>
    %29 = arith.addf %27, %28 : vector<128x128xf32>
    %c0_23 = arith.constant 0 : index
    %c0_24 = arith.constant 0 : index
    %30 = vector.load %arg10[%c0_23, %c0_24] : memref<128x128xf32, #tpu.memory_space<vmem>>, vector<128x128xf32>
    tpu.vector_store %arg10[%c0_23, %c0_24], %29 {strides = array<i32>} : memref<128x128xf32, #tpu.memory_space<vmem>>, vector<128x128xf32>,
    return
  }
  func.func @transform_0(%arg0: i32) -> (i32, i32) {
    %c0_i32 = arith.constant 0 : i32
    %c0_i32_0 = arith.constant 0 : i32
    return %arg0, %c0_i32 : i32, i32
  }
  func.func @transform_1(%arg0: i32) -> (i32, i32) {
    %c0_i32 = arith.constant 0 : i32
    %c0_i32_0 = arith.constant 0 : i32
    %c0_i32_1 = arith.constant 0 : i32
    return %c0_i32, %c0_i32_0 : i32, i32
  }
  func.func @transform_2(%arg0: i32) -> (i32, i32) {
    %c0_i32 = arith.constant 0 : i32
    %c0_i32_0 = arith.constant 0 : i32
    %c0_i32_1 = arith.constant 0 : i32
    return %c0_i32, %c0_i32_0 : i32, i32
  }
  func.func @transform_3(%arg0: i32) -> (i32, i32) {
    %c0_i32 = arith.constant 0 : i32
    %c0_i32_0 = arith.constant 0 : i32
    %c0_i32_1 = arith.constant 0 : i32
    return %c0_i32, %c0_i32_0 : i32, i32
  }
  func.func @transform_4(%arg0: i32) -> (i32, i32) {
    %c0_i32 = arith.constant 0 : i32
    %c0_i32_0 = arith.constant 0 : i32
    %c0_i32_1 = arith.constant 0 : i32
    return %c0_i32, %c0_i32_0 : i32, i32
  }
  func.func @transform_5(%arg0: i32) -> (i32, i32) {
    %c0_i32 = arith.constant 0 : i32
    %c0_i32_0 = arith.constant 0 : i32
    %c0_i32_1 = arith.constant 0 : i32
    return %c0_i32, %c0_i32_0 : i32, i32
  }
  func.func @transform_6(%arg0: i32) -> (i32, i32) {
    %c0_i32 = arith.constant 0 : i32
    %c0_i32_0 = arith.constant 0 : i32
    %c0_i32_1 = arith.constant 0 : i32
    return %c0_i32, %c0_i32_0 : i32, i32
  }
  func.func @transform_7(%arg0: i32) -> (i32, i32) {
    %c0_i32 = arith.constant 0 : i32
    %c0_i32_0 = arith.constant 0 : i32
    %c0_i32_1 = arith.constant 0 : i32
    return %c0_i32, %c0_i32_0 : i32, i32
  }
  func.func @transform_8(%arg0: i32) -> (i32, i32) {
    %c0_i32 = arith.constant 0 : i32
    %c0_i32_0 = arith.constant 0 : i32
    %c0_i32_1 = arith.constant 0 : i32
    return %c0_i32, %c0_i32_0 : i32, i32
  }
  func.func @transform_9(%arg0: i32) -> (i32, i32) {
    %c0_i32 = arith.constant 0 : i32
    %c0_i32_0 = arith.constant 0 : i32
    return %arg0, %c0_i32 : i32, i32
  }
}

module attributes {stable_mosaic.version = 11 : i64} {
  func.func @_mlp_kernel(%arg0: i32, %arg1: memref<128x128xbf16, #tpu.memory_space<vmem>>, %arg2: memref<128x128xbf16, #tpu.memory_space<vmem>>, %arg3: memref<1x128xf32, #tpu.memory_space<vmem>>, %arg4: memref<128x128xbf16, #tpu.memory_space<vmem>>, %arg5: memref<1x128xf32, #tpu.memory_space<vmem>>, %arg6: memref<128x128xbf16, #tpu.memory_space<vmem>>, %arg7: memref<1x128xf32, #tpu.memory_space<vmem>>, %arg8: memref<128x128xbf16, #tpu.memory_space<vmem>>, %arg9: memref<1x128xf32, #tpu.memory_space<vmem>>, %arg10: memref<128x128xf32, #tpu.memory_space<vmem>>) attributes {dimension_semantics = [#tpu.dimension_semantics<parallel>], iteration_bounds = array<i64: 1>, scalar_prefetch = 0 : i64, scratch_operands = 0 : i64, tpu.core_type = #tpu.core_type<tc>, window_params = [{transform_indices = @transform_0, window_bounds = array<i64: 128, 128>}, {pipeline_mode = #tpu.pipeline_mode<synchronous>, transform_indices = @transform_1, window_bounds = array<i64: 128, 128>}, {pipeline_mode = #tpu.pipeline_mode<synchronous>, transform_indices = @transform_2, window_bounds = array<i64: 1, 128>}, {pipeline_mode = #tpu.pipeline_mode<synchronous>, transform_indices = @transform_3, window_bounds = array<i64: 128, 128>}, {pipeline_mode = #tpu.pipeline_mode<synchronous>, transform_indices = @transform_4, window_bounds = array<i64: 1, 128>}, {pipeline_mode = #tpu.pipeline_mode<synchronous>, transform_indices = @transform_5, window_bounds = array<i64: 128, 128>}, {pipeline_mode = #tpu.pipeline_mode<synchronous>, transform_indices = @transform_6, window_bounds = array<i64: 1, 128>}, {pipeline_mode = #tpu.pipeline_mode<synchronous>, transform_indices = @transform_7, window_bounds = array<i64: 128, 128>}, {pipeline_mode = #tpu.pipeline_mode<synchronous>, transform_indices = @transform_8, window_bounds = array<i64: 1, 128>}, {transform_indices = @transform_9, window_bounds = array<i64: 128, 128>}]} {
    %c0 = arith.constant 0 : index
    %c0_0 = arith.constant 0 : index
    %0 = vector.load %arg1[%c0, %c0_0] : memref<128x128xbf16, #tpu.memory_space<vmem>>, vector<128x128xbf16>
    %c0_1 = arith.constant 0 : index
    %c0_2 = arith.constant 0 : index
    %1 = vector.load %arg2[%c0_1, %c0_2] : memref<128x128xbf16, #tpu.memory_space<vmem>>, vector<128x128xbf16>
    %c0_3 = arith.constant 0 : index
    %c0_4 = arith.constant 0 : index
    %2 = vector.load %arg3[%c0_3, %c0_4] : memref<1x128xf32, #tpu.memory_space<vmem>>, vector<1x128xf32>
    %cst = arith.constant dense<0.000000e+00> : vector<128x128xf32>
    %3 = tpu.matmul %0, %1, %cst {dimension_numbers = #tpu.dot_dimension_numbers<[1], [0], [0], [1], [0, 0, 1, 1], [], []>} : vector<128x128xbf16>, vector<128x128xbf16>, vector<128x128xf32> -> vector<128x128xf32>
    %4 = vector.broadcast %2 : vector<1x128xf32> to vector<128x128xf32>
    %5 = arith.addf %3, %4 : vector<128x128xf32>
    %cst_5 = arith.constant 0.000000e+00 : f32
    %6 = vector.broadcast %cst_5 : f32 to vector<128x128xf32>
    %7 = arith.maximumf %5, %6 : vector<128x128xf32>
    %8 = arith.truncf %7 : vector<128x128xf32> to vector<128x128xbf16>
    %c0_6 = arith.constant 0 : index
    %c0_7 = arith.constant 0 : index
    %9 = vector.load %arg4[%c0_6, %c0_7] : memref<128x128xbf16, #tpu.memory_space<vmem>>, vector<128x128xbf16>
    %c0_8 = arith.constant 0 : index
    %c0_9 = arith.constant 0 : index
    %10 = vector.load %arg5[%c0_8, %c0_9] : memref<1x128xf32, #tpu.memory_space<vmem>>, vector<1x128xf32>
    %cst_10 = arith.constant dense<0.000000e+00> : vector<128x128xf32>
    %11 = tpu.matmul %8, %9, %cst_10 {dimension_numbers = #tpu.dot_dimension_numbers<[1], [0], [0], [1], [0, 0, 1, 1], [], []>} : vector<128x128xbf16>, vector<128x128xbf16>, vector<128x128xf32> -> vector<128x128xf32>
    %12 = vector.broadcast %10 : vector<1x128xf32> to vector<128x128xf32>
    %13 = arith.addf %11, %12 : vector<128x128xf32>
    %cst_11 = arith.constant 0.000000e+00 : f32
    %14 = vector.broadcast %cst_11 : f32 to vector<128x128xf32>
    %15 = arith.maximumf %13, %14 : vector<128x128xf32>
    %16 = arith.truncf %15 : vector<128x128xf32> to vector<128x128xbf16>
    %c0_12 = arith.constant 0 : index
    %c0_13 = arith.constant 0 : index
    %17 = vector.load %arg6[%c0_12, %c0_13] : memref<128x128xbf16, #tpu.memory_space<vmem>>, vector<128x128xbf16>
    %c0_14 = arith.constant 0 : index
    %c0_15 = arith.constant 0 : index
    %18 = vector.load %arg7[%c0_14, %c0_15] : memref<1x128xf32, #tpu.memory_space<vmem>>, vector<1x128xf32>
    %cst_16 = arith.constant dense<0.000000e+00> : vector<128x128xf32>
    %19 = tpu.matmul %16, %17, %cst_16 {dimension_numbers = #tpu.dot_dimension_numbers<[1], [0], [0], [1], [0, 0, 1, 1], [], []>} : vector<128x128xbf16>, vector<128x128xbf16>, vector<128x128xf32> -> vector<128x128xf32>
    %20 = vector.broadcast %18 : vector<1x128xf32> to vector<128x128xf32>
    %21 = arith.addf %19, %20 : vector<128x128xf32>
    %cst_17 = arith.constant 0.000000e+00 : f32
    %22 = vector.broadcast %cst_17 : f32 to vector<128x128xf32>
    %23 = arith.maximumf %21, %22 : vector<128x128xf32>
    %24 = arith.truncf %23 : vector<128x128xf32> to vector<128x128xbf16>
    %c0_18 = arith.constant 0 : index
    %c0_19 = arith.constant 0 : index
    %25 = vector.load %arg8[%c0_18, %c0_19] : memref<128x128xbf16, #tpu.memory_space<vmem>>, vector<128x128xbf16>
    %c0_20 = arith.constant 0 : index
    %c0_21 = arith.constant 0 : index
    %26 = vector.load %arg9[%c0_20, %c0_21] : memref<1x128xf32, #tpu.memory_space<vmem>>, vector<1x128xf32>
    %cst_22 = arith.constant dense<0.000000e+00> : vector<128x128xf32>
    %27 = tpu.matmul %24, %25, %cst_22 {dimension_numbers = #tpu.dot_dimension_numbers<[1], [0], [0], [1], [0, 0, 1, 1], [], []>} : vector<128x128xbf16>, vector<128x128xbf16>, vector<128x128xf32> -> vector<128x128xf32>
    %28 = vector.broadcast %26 : vector<1x128xf32> to vector<128x128xf32>
    %29 = arith.addf %27, %28 : vector<128x128xf32>
    %c0_23 = arith.constant 0 : index
    %c0_24 = arith.constant 0 : index
    %30 = vector.load %arg10[%c0_23, %c0_24] : memref<128x128xf32, #tpu.memory_space<vmem>>, vector<128x128xf32>
    tpu.vector_store %arg10[%c0_23, %c0_24], %29 {strides = array<i32>} : memref<128x128xf32, #tpu.memory_space<vmem>>, vector<128x128xf32>,
    return
  }
  func.func @transform_0(%arg0: i32) -> (i32, i32) {
    %c0_i32 = arith.constant 0 : i32
    %c0_i32_0 = arith.constant 0 : i32
    return %arg0, %c0_i32 : i32, i32
  }
  func.func @transform_1(%arg0: i32) -> (i32, i32) {
    %c0_i32 = arith.constant 0 : i32
    %c0_i32_0 = arith.constant 0 : i32
    %c0_i32_1 = arith.constant 0 : i32
    return %c0_i32, %c0_i32_0 : i32, i32
  }
  func.func @transform_2(%arg0: i32) -> (i32, i32) {
    %c0_i32 = arith.constant 0 : i32
    %c0_i32_0 = arith.constant 0 : i32
    %c0_i32_1 = arith.constant 0 : i32
    return %c0_i32, %c0_i32_0 : i32, i32
  }
  func.func @transform_3(%arg0: i32) -> (i32, i32) {
    %c0_i32 = arith.constant 0 : i32
    %c0_i32_0 = arith.constant 0 : i32
    %c0_i32_1 = arith.constant 0 : i32
    return %c0_i32, %c0_i32_0 : i32, i32
  }
  func.func @transform_4(%arg0: i32) -> (i32, i32) {
    %c0_i32 = arith.constant 0 : i32
    %c0_i32_0 = arith.constant 0 : i32
    %c0_i32_1 = arith.constant 0 : i32
    return %c0_i32, %c0_i32_0 : i32, i32
  }
  func.func @transform_5(%arg0: i32) -> (i32, i32) {
    %c0_i32 = arith.constant 0 : i32
    %c0_i32_0 = arith.constant 0 : i32
    %c0_i32_1 = arith.constant 0 : i32
    return %c0_i32, %c0_i32_0 : i32, i32
  }
  func.func @transform_6(%arg0: i32) -> (i32, i32) {
    %c0_i32 = arith.constant 0 : i32
    %c0_i32_0 = arith.constant 0 : i32
    %c0_i32_1 = arith.constant 0 : i32
    return %c0_i32, %c0_i32_0 : i32, i32
  }
  func.func @transform_7(%arg0: i32) -> (i32, i32) {
    %c0_i32 = arith.constant 0 : i32
    %c0_i32_0 = arith.constant 0 : i32
    %c0_i32_1 = arith.constant 0 : i32
    return %c0_i32, %c0_i32_0 : i32, i32
  }
  func.func @transform_8(%arg0: i32) -> (i32, i32) {
    %c0_i32 = arith.constant 0 : i32
    %c0_i32_0 = arith.constant 0 : i32
    %c0_i32_1 = arith.constant 0 : i32
    return %c0_i32, %c0_i32_0 : i32, i32
  }
  func.func @transform_9(%arg0: i32) -> (i32, i32) {
    %c0_i32 = arith.constant 0 : i32
    %c0_i32_0 = arith.constant 0 : i32
    return %arg0, %c0_i32 : i32, i32
  }
}

</mosaic_0001>

<bundles_post_ra>
// kernel: tpu_custom_call.1
= control target key start
LH: loop header
LB: loop body
LE: loop exit
PB: predicated region body
PF: predicated region fallthrough
CT: control target
= control target key end

     0   :  { %14 = vsyncpa [#allocation3], 0  ;;  %s1464_s0 = inlined_call_operand.hbm [shape: bf16[128,128], index: 0, kind: input, shape index: {}]   ;;  %s1465_s1 = inlined_call_operand.hbm [shape: bf16[128,128], index: 1, kind: input, shape index: {}]   ;;  %s1466_s2 = inlined_call_operand.vmem [shape: f32[1,128], index: 2, kind: input, shape index: {}]   ;;  %s1467_s3 = inlined_call_operand.hbm [shape: bf16[128,128], index: 3, kind: input, shape index: {}]   ;;  %s1468_s4 = inlined_call_operand.vmem [shape: f32[1,128], index: 4, kind: input, shape index: {}]   ;;  %s1469_s5 = inlined_call_operand.hbm [shape: bf16[128,128], index: 5, kind: input, shape index: {}]   ;;  %s1470_s6 = inlined_call_operand.vmem [shape: f32[1,128], index: 6, kind: input, shape index: {}]   ;;  %s1471_s7 = inlined_call_operand.hbm [shape: bf16[128,128], index: 7, kind: input, shape index: {}]   ;;  %s1472_s8 = inlined_call_operand.vmem [shape: f32[1,128], index: 8, kind: input, shape index: {}]   ;;  %s1473_s9 = inlined_call_operand.hbm [shape: f32[128,128], index: 9, kind: output, shape index: {}]  }
   0x1   :  { %15 = vsyncpa [#allocation6], 0 }
   0x2   :  { %16 = vsyncpa [#allocation9], 0 }
   0x3   :  { %17 = vsyncpa [#allocation4], 0  ;;  %s1359_s30 = smov [#allocation5]   ;;  %s1360_s11 = smov [#allocation8]  }
   0x4   :  { %s35_s10 = sshll.u32 %s1359_s30, 4  ;;  %s63_s12 = sshll.u32 %s1360_s11, 4  ;;  %s36_s10 = int_to_ptr.vmem [resolvable:$true] %s35_s10  ;;  %s64_s12 = int_to_ptr.vmem [resolvable:$true] %s63_s12 }
   0x5   :  { %s1239_s13 = scalar_lea.vmem %s36_s10, 1024  ;;  %p1244_p1 = scmp.lt.s32.totalorder %s36_s10, %s36_s10 }
   0x6   :  { %p1240_p0 = scmp.ne.s32.totalorder %s36_s10, %s1239_s13  ;;  %p1245_p2 = scmp.lt.s32.totalorder %s1239_s13, %s1239_s13 }
   0x8   :  { %p1246_p3 = por %p1245_p2, %p1244_p1 }
   0xa   :  { %p1247_p4 = pnand %p1246_p3, %p1240_p0 }
   0xc   :  { %1250 = shalt.err (!%p1247_p4)
}
   0xd   :  { %s1361_s14 = smov 64   ;;  %s1362_s15 = smov 4  }
   0xe   :  { %41 = dma.hbm_to_vmem [thread:$0]  %s1465_s1, 1024, %s36_s10, [#allocation6], %s1361_s14, %s1361_s14, %s1362_s15  }
   0xf   :  { %s1259_s18 = scalar_lea.vmem %s64_s12, 1024  ;;  %p1264_p6 = scmp.lt.s32.totalorder %s64_s12, %s64_s12 }
  0x10   :  { %p1260_p5 = scmp.ne.s32.totalorder %s64_s12, %s1259_s18  ;;  %p1265_p7 = scmp.lt.s32.totalorder %s1259_s18, %s1259_s18 }
  0x12   :  { %p1266_p8 = por %p1265_p7, %p1264_p6 }
  0x14   :  { %p1267_p9 = pnand %p1266_p8, %p1260_p5 }
  0x16   :  { %1270 = shalt.err (!%p1267_p9)
}
  0x17   :  { %69 = dma.hbm_to_vmem [thread:$0]  %s1469_s5, 1024, %s64_s12, [#allocation9], %s1361_s14, %s1361_s14, %s1362_s15  }
  0x18   :  { %s1363_s21 = smov [#allocation2]   ;;  %s1364_s23 = smov [#allocation7]  }
  0x19   :  { %s23_s22 = sshll.u32 %s1363_s21, 4  ;;  %s49_s24 = sshll.u32 %s1364_s23, 4  ;;  %s24_s22 = int_to_ptr.vmem [resolvable:$true] %s23_s22  ;;  %s50_s24 = int_to_ptr.vmem [resolvable:$true] %s49_s24 }
  0x1a   :  { %s1279_s1 = scalar_lea.vmem %s24_s22, 1024  ;;  %p1284_p11 = scmp.lt.s32.totalorder %s24_s22, %s24_s22 }
  0x1b   :  { %p1280_p10 = scmp.ne.s32.totalorder %s24_s22, %s1279_s1  ;;  %p1285_p12 = scmp.lt.s32.totalorder %s1279_s1, %s1279_s1 }
  0x1d   :  { %p1286_p13 = por %p1285_p12, %p1284_p11 }
  0x1f   :  { %p1287_p0 = pnand %p1286_p13, %p1280_p10 }
  0x21   :  { %1290 = shalt.err (!%p1287_p0)
}
  0x22   :  { %29 = dma.hbm_to_vmem [thread:$0]  %s1464_s0, 1024, %s24_s22, [#allocation3], %s1361_s14, %s1361_s14, %s1362_s15  }
  0x23   :  { %s1299_s5 = scalar_lea.vmem %s50_s24, 1024  ;;  %p1304_p2 = scmp.lt.s32.totalorder %s50_s24, %s50_s24 }
  0x24   :  { %p1300_p1 = scmp.ne.s32.totalorder %s50_s24, %s1299_s5  ;;  %p1305_p3 = scmp.lt.s32.totalorder %s1299_s5, %s1299_s5 }
  0x26   :  { %p1306_p4 = por %p1305_p3, %p1304_p2 }
  0x28   :  { %p1307_p5 = pnand %p1306_p4, %p1300_p1 }
  0x2a   :  { %1310 = shalt.err (!%p1307_p5)
}
  0x2b   :  { %55 = dma.hbm_to_vmem [thread:$0]  %s1467_s3, 1024, %s50_s24, [#allocation6], %s1361_s14, %s1361_s14, %s1362_s15  }
  0x2c   :  { %s1365_s29 = smov [#allocation10]  }
  0x2d   :  { %s77_s30 = sshll.u32 %s1365_s29, 4  ;;  %s78_s30 = int_to_ptr.vmem [resolvable:$true] %s77_s30 }
  0x2e   :  { %s1319_s10 = scalar_lea.vmem %s78_s30, 1024  ;;  %p1324_p7 = scmp.lt.s32.totalorder %s78_s30, %s78_s30 }
  0x2f   :  { %p1320_p6 = scmp.ne.s32.totalorder %s78_s30, %s1319_s10  ;;  %p1325_p8 = scmp.lt.s32.totalorder %s1319_s10, %s1319_s10 }
  0x31   :  { %p1326_p9 = por %p1325_p8, %p1324_p7 }
  0x33   :  { %p1327_p10 = pnand %p1326_p9, %p1320_p6 }
  0x35   :  { %1330 = shalt.err (!%p1327_p10)
}
  0x36   :  { %83 = dma.hbm_to_vmem [thread:$0]  %s1471_s7, 1024, %s78_s30, [#allocation9], %s1361_s14, %s1361_s14, %s1362_s15  }
  0x37   :  { %1351 = dma.done.wait [#allocation3], 1024  }
  0x38   :  { %1352 = vsyncadd [#allocation3], 4294966272 }
  0x39   :  { %1353 = dma.done.wait [#allocation6], 2048  }
  0x3a   :  { %1354 = vsyncadd [#allocation6], 4294965248 }
  0x3b   :  { %1355 = dma.done.wait [#allocation9], 2048  }
  0x3c   :  { %1356 = vsyncadd [#allocation9], 4294965248  ;;  %v1191_v0 = vld [vmem:[#allocation5 + $0x38] sm:$0xff]   ;;  %v1192_v1 = vld [vmem:[#allocation5 + $0x30] sm:$0xff]  }
  0x3d   :  { %1053 = vmatprep.subr.bf16.mxu0 %v1191_v0  ;;  %v1193_v2 = vld [vmem:[#allocation5 + $0x28] sm:$0xff]   ;;  %v1194_v3 = vld [vmem:[#allocation5 + $0x20] sm:$0xff]   ;;  %v1195_v5 = vld [vmem:[#allocation5 + $0x18] sm:$0xff]  }
  0x3e   :  { %1054 = vmatpush3.bf16.msra.mxu0 %v1191_v0  ;;  %v1199_v4 = vld [vmem:[#allocation2] sm:$0xff]   ;;  %v1196_v6 = vld [vmem:[#allocation5 + $0x10] sm:$0xff]   ;;  %v1207_v7 = vld [vmem:[#allocation7 + $0x38] sm:$0xff]  }
  0x3f   :  { %1055 = vmatprep.subr.bf16.mxu0 %v1192_v1  ;;  %1069 = vmatprep.mubr.bf16.mxu0 %v1199_v4  ;;  %v1208_v8 = vld [vmem:[#allocation7 + $0x30] sm:$0xff]   ;;  %v1197_v9 = vld [vmem:[#allocation5 + $0x8] sm:$0xff]   ;;  %v1198_v11 = vld [vmem:[#allocation5] sm:$0xff]  }
  0x40   :  { %1085 = vmatprep.subr.bf16.mxu1 %v1207_v7  ;;  %v1209_v10 = vld [vmem:[#allocation7 + $0x28] sm:$0xff]   ;;  %v1210_v12 = vld [vmem:[#allocation7 + $0x20] sm:$0xff]   ;;  %v1211_v13 = vld [vmem:[#allocation7 + $0x18] sm:$0xff]  }
  0x41   :  { %1086 = vmatpush3.bf16.msra.mxu1 %v1207_v7  ;;  %v1200_v14 = vld [vmem:[#allocation2 + $0x8] sm:$0xff]   ;;  %v1201_v15 = vld [vmem:[#allocation2 + $0x10] sm:$0xff]   ;;  %v1202_v16 = vld [vmem:[#allocation2 + $0x18] sm:$0xff]  }
  0x42   :  { %1056 = vmatpush3.bf16.msra.mxu0 %v1192_v1  ;;  %1087 = vmatprep.subr.bf16.mxu1 %v1208_v8  ;;  %v1203_v17 = vld [vmem:[#allocation2 + $0x20] sm:$0xff]   ;;  %v1204_v18 = vld [vmem:[#allocation2 + $0x28] sm:$0xff]   ;;  %v1205_v19 = vld [vmem:[#allocation2 + $0x30] sm:$0xff]  }
  0x43   :  { %1057 = vmatprep.subr.bf16.mxu0 %v1193_v2  ;;  %v1206_v20 = vld [vmem:[#allocation2 + $0x38] sm:$0xff]   ;;  %v1212_v21 = vld [vmem:[#allocation7 + $0x10] sm:$0xff]   ;;  %v1213_v22 = vld [vmem:[#allocation7 + $0x8] sm:$0xff]  }
  0x44   :  { %v1214_v23 = vld [vmem:[#allocation7] sm:$0xff]   ;;  %v1215_v24 = vld [vmem:[#allocation8 + $0x38] sm:$0xff]   ;;  %v1216_v25 = vld [vmem:[#allocation8 + $0x30] sm:$0xff]  }
  0x45   :  { %1088 = vmatpush3.bf16.msra.mxu1 %v1208_v8  ;;  %v1217_v26 = vld [vmem:[#allocation8 + $0x28] sm:$0xff]   ;;  %v1218_v27 = vld [vmem:[#allocation8 + $0x20] sm:$0xff]   ;;  %v1219_v28 = vld [vmem:[#allocation8 + $0x18] sm:$0xff]  }
  0x46   :  { %1058 = vmatpush3.bf16.msra.mxu0 %v1193_v2  ;;  %1089 = vmatprep.subr.bf16.mxu1 %v1209_v10  ;;  %v945_v31 = vld [vmem:[%s1466_s2] ss:$0 sm:$0xff] }
  0x47   :  { %1059 = vmatprep.subr.bf16.mxu0 %v1194_v3 }
  0x49   :  { %1090 = vmatpush3.bf16.msra.mxu1 %v1209_v10 }
  0x4a   :  { %1060 = vmatpush3.bf16.msra.mxu0 %v1194_v3  ;;  %1091 = vmatprep.subr.bf16.mxu1 %v1210_v12 }
  0x4b   :  { %1061 = vmatprep.subr.bf16.mxu0 %v1195_v5 }
  0x4d   :  { %1092 = vmatpush3.bf16.msra.mxu1 %v1210_v12 }
  0x4e   :  { %1062 = vmatpush3.bf16.msra.mxu0 %v1195_v5  ;;  %1093 = vmatprep.subr.bf16.mxu1 %v1211_v13 }
  0x4f   :  { %1063 = vmatprep.subr.bf16.mxu0 %v1196_v6 }
  0x51   :  { %1094 = vmatpush3.bf16.msra.mxu1 %v1211_v13 }
  0x52   :  { %1064 = vmatpush3.bf16.msra.mxu0 %v1196_v6  ;;  %1095 = vmatprep.subr.bf16.mxu1 %v1212_v21 }
  0x53   :  { %1065 = vmatprep.subr.bf16.mxu0 %v1197_v9 }
  0x55   :  { %1096 = vmatpush3.bf16.msra.mxu1 %v1212_v21 }
  0x56   :  { %1066 = vmatpush3.bf16.msra.mxu0 %v1197_v9  ;;  %1097 = vmatprep.subr.bf16.mxu1 %v1213_v22 }
  0x57   :  { %1067 = vmatprep.subr.bf16.mxu0 %v1198_v11 }
  0x59   :  { %1098 = vmatpush3.bf16.msra.mxu1 %v1213_v22  ;;  %v1220_v22 = vld [vmem:[#allocation8 + $0x10] sm:$0xff]  }
  0x5a   :  { %1068 = vmatpush3.bf16.msra.mxu0 %v1198_v11  ;;  %1099 = vmatprep.subr.bf16.mxu1 %v1214_v23 }
  0x5b   :  { %1117 = vmatprep.subr.bf16.mxu0 %v1215_v24 }
  0x5d   :  { %1070 = vmatmul.mubr.bf16.vlgmr.msra.gmra.mxu0 %v1200_v14  ;;  %1100 = vmatpush3.bf16.msra.mxu1 %v1214_v23  ;;  %v1221_v23 = vld [vmem:[#allocation8 + $0x8] sm:$0xff]  }
  0x5e   :  { %1073 = vmatprep.mubr.bf16.mxu0 %v1201_v15  ;;  %1118 = vmatpush3.bf16.msra.mxu0 %v1215_v24  ;;  %v1222_v24 = vld [vmem:[#allocation8] sm:$0xff]  }
  0x5f   :  { %1119 = vmatprep.subr.bf16.mxu0 %v1216_v25 }
  0x62   :  { %1120 = vmatpush3.bf16.msra.mxu0 %v1216_v25  ;;  %v1223_v25 = vld [vmem:[#allocation10 + $0x38] sm:$0xff]  }
  0x63   :  { %1121 = vmatprep.subr.bf16.mxu0 %v1217_v26  ;;  %1149 = vmatprep.subr.bf16.mxu1 %v1223_v25 }
  0x65   :  { %1074 = vmatmul.mubr.bf16.gmra.mxu0 %v1202_v16 }
  0x66   :  { %1077 = vmatprep.mubr.bf16.mxu0 %v1203_v17  ;;  %1122 = vmatpush3.bf16.msra.mxu0 %v1217_v26  ;;  %v1224_v26 = vld [vmem:[#allocation10 + $0x30] sm:$0xff]  }
  0x67   :  { %1123 = vmatprep.subr.bf16.mxu0 %v1218_v27 }
  0x6a   :  { %1124 = vmatpush3.bf16.msra.mxu0 %v1218_v27  ;;  %v1225_v27 = vld [vmem:[#allocation10 + $0x28] sm:$0xff]  }
  0x6b   :  { %1125 = vmatprep.subr.bf16.mxu0 %v1219_v28 }
  0x6d   :  { %1078 = vmatmul.mubr.bf16.gmra.mxu0 %v1204_v18 }
  0x6e   :  { %1081 = vmatprep.mubr.bf16.mxu0 %v1205_v19  ;;  %1126 = vmatpush3.bf16.msra.mxu0 %v1219_v28  ;;  %v1226_v28 = vld [vmem:[#allocation10 + $0x20] sm:$0xff]  }
  0x6f   :  { %1127 = vmatprep.subr.bf16.mxu0 %v1220_v22 }
  0x72   :  { %1128 = vmatpush3.bf16.msra.mxu0 %v1220_v22 }
  0x73   :  { %1129 = vmatprep.subr.bf16.mxu0 %v1221_v23 }
  0x75   :  { %1082 = vmatmul.mubr.bf16.gmra.mxu0 %v1206_v20 }
  0x76   :  { %1130 = vmatpush3.bf16.msra.mxu0 %v1221_v23  ;;  %v1228_v23 = vld [vmem:[#allocation10 + $0x10] sm:$0xff]  }
  0x77   :  { %1131 = vmatprep.subr.bf16.mxu0 %v1222_v24 }
  0x7a   :  { %1132 = vmatpush3.bf16.msra.mxu0 %v1222_v24  ;;  %v1229_v24 = vld [vmem:[#allocation10 + $0x8] sm:$0xff]  }
 0x11d   :  { %v1071_v29 = vpop.f32.mrf.mxu0 }
 0x11e   :  { %v280_v35 = vadd.f32 %v1071_v29, %v945_v31  ;;  %v1227_v29 = vld [vmem:[#allocation10 + $0x18] sm:$0xff]  }
 0x11f   :  { %v271_v30 = vpop.f32.mrf.mxu0 }
 0x120   :  { %v272_v33 = vadd.f32 %v945_v31, %v271_v30  ;;  %v336_v42 = vmax.f32 %v280_v35, 0.0 }
 0x121   :  { %v1072_v32 = vpop.f32.mrf.mxu0 }
 0x122   :  { %v283_v34 = vadd.f32 %v1072_v32, %v945_v31  ;;  %v334_v40 = vmax.f32 %v272_v33, 0.0  ;;  %v962_v32 = vld [vmem:[%s1468_s4] ss:$0 sm:$0xff] }
 0x123   :  { %v274_v36 = vpop.f32.mrf.mxu0 }
 0x124   :  { %v275_v37 = vadd.f32 %v945_v31, %v274_v36  ;;  %v337_v38 = vmax.f32 %v283_v34, 0.0 }
 0x125   :  { %v1075_v39 = vpop.f32.mrf.mxu0 }
 0x126   :  { %v335_v41 = vmax.f32 %v275_v37, 0.0  ;;  %v351_v45 = vpack.c.bf16 %v337_v38, %v336_v42  ;;  %v296_v49 = vadd.f32 %v1075_v39, %v945_v31 }
 0x127   :  { %v287_v43 = vpop.f32.mrf.mxu0 }
 0x128   :  { %v350_v44 = vpack.c.bf16 %v335_v41, %v334_v40  ;;  %v288_v47 = vadd.f32 %v945_v31, %v287_v43  ;;  %v340_v56 = vmax.f32 %v296_v49, 0.0 }
 0x129   :  { %v1076_v46 = vpop.f32.mrf.mxu0 }
 0x12a   :  { %v299_v48 = vadd.f32 %v1076_v46, %v945_v31  ;;  %1101 = vmatprep.mubr.bf16.mxu1 %v350_v44  ;;  %v338_v54 = vmax.f32 %v288_v47, 0.0 }
 0x12b   :  { %v290_v50 = vpop.f32.mrf.mxu0  ;;  %1102 = vmatmul.mubr.bf16.vlgmr.msra.gmra.mxu1 %v351_v45 }
 0x12c   :  { %v291_v51 = vadd.f32 %v945_v31, %v290_v50  ;;  %v341_v52 = vmax.f32 %v299_v48, 0.0  ;;  %1150 = vmatpush3.bf16.msra.mxu1 %v1223_v25  ;;  %v1230_v25 = vld [vmem:[#allocation10] sm:$0xff]  }
 0x12d   :  { %v1079_v53 = vpop.f32.mrf.mxu0  ;;  %1151 = vmatprep.subr.bf16.mxu1 %v1224_v26 }
 0x12e   :  { %v339_v55 = vmax.f32 %v291_v51, 0.0  ;;  %v353_v59 = vpack.c.bf16 %v341_v52, %v340_v56  ;;  %v312_v63 = vadd.f32 %v1079_v53, %v945_v31 }
 0x12f   :  { %v303_v57 = vpop.f32.mrf.mxu0 }
 0x130   :  { %v352_v58 = vpack.c.bf16 %v339_v55, %v338_v54  ;;  %v304_v61 = vadd.f32 %v945_v31, %v303_v57  ;;  %v344_v6 = vmax.f32 %v312_v63, 0.0  ;;  %1152 = vmatpush3.bf16.msra.mxu1 %v1224_v26 }
 0x131   :  { %v1080_v60 = vpop.f32.mrf.mxu0  ;;  %1153 = vmatprep.subr.bf16.mxu1 %v1225_v27 }
 0x132   :  { %v315_v62 = vadd.f32 %v1080_v60, %v945_v31  ;;  %1105 = vmatprep.mubr.bf16.mxu1 %v352_v58  ;;  %v342_v4 = vmax.f32 %v304_v61, 0.0 }
 0x133   :  { %v306_v0 = vpop.f32.mrf.mxu0  ;;  %1106 = vmatmul.mubr.bf16.gmra.mxu1 %v353_v59 }
 0x134   :  { %v307_v1 = vadd.f32 %v945_v31, %v306_v0  ;;  %v345_v2 = vmax.f32 %v315_v62, 0.0  ;;  %1154 = vmatpush3.bf16.msra.mxu1 %v1225_v27 }
 0x135   :  { %v1083_v3 = vpop.f32.mrf.mxu0  ;;  %1155 = vmatprep.subr.bf16.mxu1 %v1226_v28 }
 0x136   :  { %v343_v5 = vmax.f32 %v307_v1, 0.0  ;;  %v355_v9 = vpack.c.bf16 %v345_v2, %v344_v6  ;;  %v328_v13 = vadd.f32 %v1083_v3, %v945_v31 }
 0x137   :  { %v319_v7 = vpop.f32.mrf.mxu0 }
 0x138   :  { %v354_v8 = vpack.c.bf16 %v343_v5, %v342_v4  ;;  %v320_v11 = vadd.f32 %v945_v31, %v319_v7  ;;  %v348_v19 = vmax.f32 %v328_v13, 0.0  ;;  %1156 = vmatpush3.bf16.msra.mxu1 %v1226_v28  ;;  %v971_v28 = vld [vmem:[%s1470_s6] ss:$0 sm:$0xff] }
 0x139   :  { %v1084_v10 = vpop.f32.mrf.mxu0  ;;  %1157 = vmatprep.subr.bf16.mxu1 %v1227_v29 }
 0x13a   :  { %v331_v12 = vadd.f32 %v1084_v10, %v945_v31  ;;  %1109 = vmatprep.mubr.bf16.mxu1 %v354_v8  ;;  %v346_v17 = vmax.f32 %v320_v11, 0.0 }
 0x13b   :  { %v322_v14 = vpop.f32.mrf.mxu0  ;;  %1110 = vmatmul.mubr.bf16.gmra.mxu1 %v355_v9 }
 0x13c   :  { %v323_v15 = vadd.f32 %v945_v31, %v322_v14  ;;  %v349_v16 = vmax.f32 %v331_v12, 0.0  ;;  %1158 = vmatpush3.bf16.msra.mxu1 %v1227_v29 }
 0x13d   :  { %1159 = vmatprep.subr.bf16.mxu1 %v1228_v23 }
 0x13e   :  { %v347_v18 = vmax.f32 %v323_v15, 0.0  ;;  %v357_v21 = vpack.c.bf16 %v349_v16, %v348_v19 }
 0x140   :  { %v356_v20 = vpack.c.bf16 %v347_v18, %v346_v17  ;;  %1160 = vmatpush3.bf16.msra.mxu1 %v1228_v23 }
 0x141   :  { %1161 = vmatprep.subr.bf16.mxu1 %v1229_v24 }
 0x142   :  { %1113 = vmatprep.mubr.bf16.mxu1 %v356_v20 }
 0x143   :  { %1114 = vmatmul.mubr.bf16.gmra.mxu1 %v357_v21 }
 0x144   :  { %1162 = vmatpush3.bf16.msra.mxu1 %v1229_v24 }
 0x145   :  { %1163 = vmatprep.subr.bf16.mxu1 %v1230_v25 }
 0x148   :  { %1164 = vmatpush3.bf16.msra.mxu1 %v1230_v25 }
 0x1eb   :  { %v1103_v30 = vpop.f32.mrf.mxu1 }
 0x1ec   :  { %v472_v36 = vadd.f32 %v1103_v30, %v962_v32 }
 0x1ed   :  { %v463_v31 = vpop.f32.mrf.mxu1 }
 0x1ee   :  { %v464_v34 = vadd.f32 %v962_v32, %v463_v31  ;;  %v528_v43 = vmax.f32 %v472_v36, 0.0 }
 0x1ef   :  { %v1104_v33 = vpop.f32.mrf.mxu1 }
 0x1f0   :  { %v475_v35 = vadd.f32 %v1104_v33, %v962_v32  ;;  %v526_v41 = vmax.f32 %v464_v34, 0.0 }
 0x1f1   :  { %v466_v37 = vpop.f32.mrf.mxu1 }
 0x1f2   :  { %v467_v38 = vadd.f32 %v962_v32, %v466_v37  ;;  %v529_v39 = vmax.f32 %v475_v35, 0.0 }
 0x1f3   :  { %v1107_v40 = vpop.f32.mrf.mxu1 }
 0x1f4   :  { %v527_v42 = vmax.f32 %v467_v38, 0.0  ;;  %v543_v46 = vpack.c.bf16 %v529_v39, %v528_v43  ;;  %v488_v50 = vadd.f32 %v1107_v40, %v962_v32 }
 0x1f5   :  { %v479_v44 = vpop.f32.mrf.mxu1 }
 0x1f6   :  { %v542_v45 = vpack.c.bf16 %v527_v42, %v526_v41  ;;  %v480_v48 = vadd.f32 %v962_v32, %v479_v44  ;;  %v532_v57 = vmax.f32 %v488_v50, 0.0 }
 0x1f7   :  { %v1108_v47 = vpop.f32.mrf.mxu1 }
 0x1f8   :  { %v491_v49 = vadd.f32 %v1108_v47, %v962_v32  ;;  %1133 = vmatprep.mubr.bf16.mxu0 %v542_v45  ;;  %v530_v55 = vmax.f32 %v480_v48, 0.0 }
 0x1f9   :  { %v482_v51 = vpop.f32.mrf.mxu1  ;;  %1134 = vmatmul.mubr.bf16.vlgmr.msra.gmra.mxu0 %v543_v46 }
 0x1fa   :  { %v483_v52 = vadd.f32 %v962_v32, %v482_v51  ;;  %v533_v53 = vmax.f32 %v491_v49, 0.0 }
 0x1fb   :  { %v1111_v54 = vpop.f32.mrf.mxu1 }
 0x1fc   :  { %v531_v56 = vmax.f32 %v483_v52, 0.0  ;;  %v545_v60 = vpack.c.bf16 %v533_v53, %v532_v57  ;;  %v504_v0 = vadd.f32 %v1111_v54, %v962_v32 }
 0x1fd   :  { %v495_v58 = vpop.f32.mrf.mxu1 }
 0x1fe   :  { %v544_v59 = vpack.c.bf16 %v531_v56, %v530_v55  ;;  %v496_v62 = vadd.f32 %v962_v32, %v495_v58  ;;  %v536_v7 = vmax.f32 %v504_v0, 0.0 }
 0x1ff   :  { %v1112_v61 = vpop.f32.mrf.mxu1 }
 0x200   :  { %v507_v63 = vadd.f32 %v1112_v61, %v962_v32  ;;  %1137 = vmatprep.mubr.bf16.mxu0 %v544_v59  ;;  %v534_v5 = vmax.f32 %v496_v62, 0.0 }
 0x201   :  { %v498_v1 = vpop.f32.mrf.mxu1  ;;  %1138 = vmatmul.mubr.bf16.gmra.mxu0 %v545_v60 }
 0x202   :  { %v499_v2 = vadd.f32 %v962_v32, %v498_v1  ;;  %v537_v3 = vmax.f32 %v507_v63, 0.0 }
 0x203   :  { %v1115_v4 = vpop.f32.mrf.mxu1 }
 0x204   :  { %v535_v6 = vmax.f32 %v499_v2, 0.0  ;;  %v547_v10 = vpack.c.bf16 %v537_v3, %v536_v7  ;;  %v520_v14 = vadd.f32 %v1115_v4, %v962_v32 }
 0x205   :  { %v511_v8 = vpop.f32.mrf.mxu1 }
 0x206   :  { %v546_v9 = vpack.c.bf16 %v535_v6, %v534_v5  ;;  %v512_v12 = vadd.f32 %v962_v32, %v511_v8  ;;  %v540_v20 = vmax.f32 %v520_v14, 0.0 }
 0x207   :  { %v1116_v11 = vpop.f32.mrf.mxu1 }
 0x208   :  { %v523_v13 = vadd.f32 %v1116_v11, %v962_v32  ;;  %1141 = vmatprep.mubr.bf16.mxu0 %v546_v9  ;;  %v538_v18 = vmax.f32 %v512_v12, 0.0 }
 0x209   :  { %v514_v15 = vpop.f32.mrf.mxu1  ;;  %1142 = vmatmul.mubr.bf16.gmra.mxu0 %v547_v10 }
 0x20a   :  { %v515_v16 = vadd.f32 %v962_v32, %v514_v15  ;;  %v541_v17 = vmax.f32 %v523_v13, 0.0 }
 0x20c   :  { %v539_v19 = vmax.f32 %v515_v16, 0.0  ;;  %v549_v22 = vpack.c.bf16 %v541_v17, %v540_v20 }
 0x20e   :  { %v548_v21 = vpack.c.bf16 %v539_v19, %v538_v18  ;;  %v980_v19 = vld [vmem:[%s1472_s8] ss:$0 sm:$0xff]  ;;  %s1366_s8 = smov [#allocation11]  }
 0x20f   :  { %s931_s15 = sshll.u32 %s1366_s8, 4  ;;  %s932_s15 = int_to_ptr.vmem [resolvable:$true] %s931_s15 }
 0x210   :  { %1145 = vmatprep.mubr.bf16.mxu0 %v548_v21  ;;  %s1331_s16 = scalar_lea.vmem %s932_s15, 2048  ;;  %p1336_p12 = scmp.lt.s32.totalorder %s932_s15, %s932_s15 }
 0x211   :  { %1146 = vmatmul.mubr.bf16.gmra.mxu0 %v549_v22  ;;  %p1332_p11 = scmp.ne.s32.totalorder %s932_s15, %s1331_s16  ;;  %p1337_p13 = scmp.lt.s32.totalorder %s1331_s16, %s1331_s16 }
 0x213   :  { %p1338_p0 = por %p1337_p13, %p1336_p12 }
 0x215   :  { %p1339_p1 = pnand %p1338_p0, %p1332_p11 }
 0x2b9   :  { %v1135_v26 = vpop.f32.mrf.mxu0 }
 0x2ba   :  { %v664_v32 = vadd.f32 %v1135_v26, %v971_v28 }
 0x2bb   :  { %v655_v27 = vpop.f32.mrf.mxu0 }
 0x2bc   :  { %v656_v30 = vadd.f32 %v971_v28, %v655_v27  ;;  %v720_v39 = vmax.f32 %v664_v32, 0.0 }
 0x2bd   :  { %v1136_v29 = vpop.f32.mrf.mxu0 }
 0x2be   :  { %v667_v31 = vadd.f32 %v1136_v29, %v971_v28  ;;  %v718_v37 = vmax.f32 %v656_v30, 0.0 }
 0x2bf   :  { %v658_v33 = vpop.f32.mrf.mxu0 }
 0x2c0   :  { %v659_v34 = vadd.f32 %v971_v28, %v658_v33  ;;  %v721_v35 = vmax.f32 %v667_v31, 0.0 }
 0x2c1   :  { %v1139_v36 = vpop.f32.mrf.mxu0 }
 0x2c2   :  { %v719_v38 = vmax.f32 %v659_v34, 0.0  ;;  %v735_v42 = vpack.c.bf16 %v721_v35, %v720_v39  ;;  %v680_v46 = vadd.f32 %v1139_v36, %v971_v28 }
 0x2c3   :  { %v671_v40 = vpop.f32.mrf.mxu0 }
 0x2c4   :  { %v734_v41 = vpack.c.bf16 %v719_v38, %v718_v37  ;;  %v672_v44 = vadd.f32 %v971_v28, %v671_v40  ;;  %v724_v53 = vmax.f32 %v680_v46, 0.0 }
 0x2c5   :  { %v1140_v43 = vpop.f32.mrf.mxu0 }
 0x2c6   :  { %v683_v45 = vadd.f32 %v1140_v43, %v971_v28  ;;  %1165 = vmatprep.mubr.bf16.mxu1 %v734_v41  ;;  %v722_v51 = vmax.f32 %v672_v44, 0.0 }
 0x2c7   :  { %v674_v47 = vpop.f32.mrf.mxu0  ;;  %1166 = vmatmul.mubr.bf16.vlgmr.msra.gmra.mxu1 %v735_v42 }
 0x2c8   :  { %v675_v48 = vadd.f32 %v971_v28, %v674_v47  ;;  %v725_v49 = vmax.f32 %v683_v45, 0.0 }
 0x2c9   :  { %v1143_v50 = vpop.f32.mrf.mxu0 }
 0x2ca   :  { %v723_v52 = vmax.f32 %v675_v48, 0.0  ;;  %v737_v56 = vpack.c.bf16 %v725_v49, %v724_v53  ;;  %v696_v60 = vadd.f32 %v1143_v50, %v971_v28 }
 0x2cb   :  { %v687_v54 = vpop.f32.mrf.mxu0 }
 0x2cc   :  { %v736_v55 = vpack.c.bf16 %v723_v52, %v722_v51  ;;  %v688_v58 = vadd.f32 %v971_v28, %v687_v54  ;;  %v728_v3 = vmax.f32 %v696_v60, 0.0 }
 0x2cd   :  { %v1144_v57 = vpop.f32.mrf.mxu0 }
 0x2ce   :  { %v699_v59 = vadd.f32 %v1144_v57, %v971_v28  ;;  %1169 = vmatprep.mubr.bf16.mxu1 %v736_v55  ;;  %v726_v1 = vmax.f32 %v688_v58, 0.0 }
 0x2cf   :  { %v690_v61 = vpop.f32.mrf.mxu0  ;;  %1170 = vmatmul.mubr.bf16.gmra.mxu1 %v737_v56 }
 0x2d0   :  { %v691_v62 = vadd.f32 %v971_v28, %v690_v61  ;;  %v729_v63 = vmax.f32 %v699_v59, 0.0 }
 0x2d1   :  { %v1147_v0 = vpop.f32.mrf.mxu0 }
 0x2d2   :  { %v727_v2 = vmax.f32 %v691_v62, 0.0  ;;  %v739_v6 = vpack.c.bf16 %v729_v63, %v728_v3  ;;  %v712_v10 = vadd.f32 %v1147_v0, %v971_v28 }
 0x2d3   :  { %v703_v4 = vpop.f32.mrf.mxu0 }
 0x2d4   :  { %v738_v5 = vpack.c.bf16 %v727_v2, %v726_v1  ;;  %v704_v8 = vadd.f32 %v971_v28, %v703_v4  ;;  %v732_v16 = vmax.f32 %v712_v10, 0.0 }
 0x2d5   :  { %v1148_v7 = vpop.f32.mrf.mxu0 }
 0x2d6   :  { %v715_v9 = vadd.f32 %v1148_v7, %v971_v28  ;;  %1173 = vmatprep.mubr.bf16.mxu1 %v738_v5  ;;  %v730_v14 = vmax.f32 %v704_v8, 0.0 }
 0x2d7   :  { %v706_v11 = vpop.f32.mrf.mxu0  ;;  %1174 = vmatmul.mubr.bf16.gmra.mxu1 %v739_v6 }
 0x2d8   :  { %v707_v12 = vadd.f32 %v971_v28, %v706_v11  ;;  %v733_v13 = vmax.f32 %v715_v9, 0.0 }
 0x2da   :  { %v731_v15 = vmax.f32 %v707_v12, 0.0  ;;  %v741_v18 = vpack.c.bf16 %v733_v13, %v732_v16 }
 0x2dc   :  { %v740_v17 = vpack.c.bf16 %v731_v15, %v730_v14 }
 0x2de   :  { %1177 = vmatprep.mubr.bf16.mxu1 %v740_v17 }
 0x2df   :  { %1178 = vmatmul.mubr.bf16.gmra.mxu1 %v741_v18 }
 0x387   :  { %v1167_v20 = vpop.f32.mrf.mxu1 }
 0x388   :  { %v856_v21 = vadd.f32 %v1167_v20, %v980_v19 }
 0x389   :  { %v847_v22 = vpop.f32.mrf.mxu1 }
 0x38a   :  { %912 = vst [vmem:[#allocation11 + $0x10] sm:$0xff] %v856_v21  ;;  %v848_v23 = vadd.f32 %v980_v19, %v847_v22 }
 0x38b   :  { %v1168_v24 = vpop.f32.mrf.mxu1 }
 0x38c   :  { %910 = vst [vmem:[#allocation11] sm:$0xff] %v848_v23  ;;  %v859_v25 = vadd.f32 %v1168_v24, %v980_v19 }
 0x38d   :  { %v850_v26 = vpop.f32.mrf.mxu1 }
 0x38e   :  { %913 = vst [vmem:[#allocation11 + $0x18] sm:$0xff] %v859_v25  ;;  %v851_v27 = vadd.f32 %v980_v19, %v850_v26 }
 0x38f   :  { %v1171_v28 = vpop.f32.mrf.mxu1 }
 0x390   :  { %911 = vst [vmem:[#allocation11 + $0x8] sm:$0xff] %v851_v27  ;;  %v872_v29 = vadd.f32 %v1171_v28, %v980_v19 }
 0x391   :  { %v863_v30 = vpop.f32.mrf.mxu1 }
 0x392   :  { %916 = vst [vmem:[#allocation11 + $0x30] sm:$0xff] %v872_v29  ;;  %v864_v31 = vadd.f32 %v980_v19, %v863_v30 }
 0x393   :  { %v1172_v32 = vpop.f32.mrf.mxu1 }
 0x394   :  { %914 = vst [vmem:[#allocation11 + $0x20] sm:$0xff] %v864_v31  ;;  %v875_v33 = vadd.f32 %v1172_v32, %v980_v19 }
 0x395   :  { %v866_v34 = vpop.f32.mrf.mxu1 }
 0x396   :  { %917 = vst [vmem:[#allocation11 + $0x38] sm:$0xff] %v875_v33  ;;  %v867_v35 = vadd.f32 %v980_v19, %v866_v34 }
 0x397   :  { %v1175_v36 = vpop.f32.mrf.mxu1 }
 0x398   :  { %915 = vst [vmem:[#allocation11 + $0x28] sm:$0xff] %v867_v35  ;;  %v888_v37 = vadd.f32 %v1175_v36, %v980_v19 }
 0x399   :  { %v879_v38 = vpop.f32.mrf.mxu1 }
 0x39a   :  { %920 = vst [vmem:[#allocation11 + $0x50] sm:$0xff] %v888_v37  ;;  %v880_v39 = vadd.f32 %v980_v19, %v879_v38 }
 0x39b   :  { %v1176_v40 = vpop.f32.mrf.mxu1 }
 0x39c   :  { %918 = vst [vmem:[#allocation11 + $0x40] sm:$0xff] %v880_v39  ;;  %v891_v41 = vadd.f32 %v1176_v40, %v980_v19 }
 0x39d   :  { %v882_v42 = vpop.f32.mrf.mxu1 }
 0x39e   :  { %921 = vst [vmem:[#allocation11 + $0x58] sm:$0xff] %v891_v41  ;;  %v883_v43 = vadd.f32 %v980_v19, %v882_v42 }
 0x39f   :  { %v1179_v44 = vpop.f32.mrf.mxu1 }
 0x3a0   :  { %919 = vst [vmem:[#allocation11 + $0x48] sm:$0xff] %v883_v43  ;;  %v904_v45 = vadd.f32 %v1179_v44, %v980_v19 }
 0x3a1   :  { %v895_v46 = vpop.f32.mrf.mxu1 }
 0x3a2   :  { %924 = vst [vmem:[#allocation11 + $0x70] sm:$0xff] %v904_v45  ;;  %v896_v47 = vadd.f32 %v980_v19, %v895_v46 }
 0x3a3   :  { %v1180_v48 = vpop.f32.mrf.mxu1 }
 0x3a4   :  { %922 = vst [vmem:[#allocation11 + $0x60] sm:$0xff] %v896_v47  ;;  %v907_v49 = vadd.f32 %v1180_v48, %v980_v19 }
 0x3a5   :  { %v898_v50 = vpop.f32.mrf.mxu1 }
 0x3a6   :  { %925 = vst [vmem:[#allocation11 + $0x78] sm:$0xff] %v907_v49  ;;  %v899_v51 = vadd.f32 %v980_v19, %v898_v50 }
 0x3a8   :  { %923 = vst [vmem:[#allocation11 + $0x68] sm:$0xff] %v899_v51 }
 0x3a9   :  { %1342 = shalt.err (!%p1339_p1)
}
 0x3aa   :  { %s1367_s17 = smov 128   ;;  %s1368_s18 = smov 8  }
 0x3ab   :  { %937 = dma.vmem_to_hbm [thread:$0]  %s932_s15, 2048, %s1473_s9, [#allocation4], %s1367_s17, %s1367_s17, %s1368_s18  }
 0x3ac   :  { %1357 = dma.done.wait [#allocation4], 2048  }
 0x3ad   :  { %1358 = vsyncadd [#allocation4], 4294965248 }
 0x3ae   :  { %941 = vsyncpa [#allocation3], 1 }
 0x3af   :  { %942 = vsyncpa [#allocation6], 1 }
 0x3b0   :  { %943 = vsyncpa [#allocation9], 1 }
 0x3b1   :  { %944 = vsyncpa [#allocation4], 1 }

// kernel: tpu_custom_call.1
= control target key start
LH: loop header
LB: loop body
LE: loop exit
PB: predicated region body
PF: predicated region fallthrough
CT: control target
= control target key end

     0   :  { %14 = vsyncpa [#allocation3], 0  ;;  %s1464_s0 = inlined_call_operand.hbm [shape: bf16[128,128], index: 0, kind: input, shape index: {}]   ;;  %s1465_s1 = inlined_call_operand.hbm [shape: bf16[128,128], index: 1, kind: input, shape index: {}]   ;;  %s1466_s2 = inlined_call_operand.vmem [shape: f32[1,128], index: 2, kind: input, shape index: {}]   ;;  %s1467_s3 = inlined_call_operand.hbm [shape: bf16[128,128], index: 3, kind: input, shape index: {}]   ;;  %s1468_s4 = inlined_call_operand.vmem [shape: f32[1,128], index: 4, kind: input, shape index: {}]   ;;  %s1469_s5 = inlined_call_operand.hbm [shape: bf16[128,128], index: 5, kind: input, shape index: {}]   ;;  %s1470_s6 = inlined_call_operand.vmem [shape: f32[1,128], index: 6, kind: input, shape index: {}]   ;;  %s1471_s7 = inlined_call_operand.hbm [shape: bf16[128,128], index: 7, kind: input, shape index: {}]   ;;  %s1472_s8 = inlined_call_operand.vmem [shape: f32[1,128], index: 8, kind: input, shape index: {}]   ;;  %s1473_s9 = inlined_call_operand.hbm [shape: f32[128,128], index: 9, kind: output, shape index: {}]  }
   0x1   :  { %15 = vsyncpa [#allocation6], 0 }
   0x2   :  { %16 = vsyncpa [#allocation9], 0 }
   0x3   :  { %17 = vsyncpa [#allocation4], 0  ;;  %s1359_s30 = smov [#allocation5]   ;;  %s1360_s11 = smov [#allocation8]  }
   0x4   :  { %s35_s10 = sshll.u32 %s1359_s30, 4  ;;  %s63_s12 = sshll.u32 %s1360_s11, 4  ;;  %s36_s10 = int_to_ptr.vmem [resolvable:$true] %s35_s10  ;;  %s64_s12 = int_to_ptr.vmem [resolvable:$true] %s63_s12 }
   0x5   :  { %s1239_s13 = scalar_lea.vmem %s36_s10, 1024  ;;  %p1244_p1 = scmp.lt.s32.totalorder %s36_s10, %s36_s10 }
   0x6   :  { %p1240_p0 = scmp.ne.s32.totalorder %s36_s10, %s1239_s13  ;;  %p1245_p2 = scmp.lt.s32.totalorder %s1239_s13, %s1239_s13 }
   0x8   :  { %p1246_p3 = por %p1245_p2, %p1244_p1 }
   0xa   :  { %p1247_p4 = pnand %p1246_p3, %p1240_p0 }
   0xc   :  { %1250 = shalt.err (!%p1247_p4)
}
   0xd   :  { %s1361_s14 = smov 64   ;;  %s1362_s15 = smov 4  }
   0xe   :  { %41 = dma.hbm_to_vmem [thread:$0]  %s1465_s1, 1024, %s36_s10, [#allocation6], %s1361_s14, %s1361_s14, %s1362_s15  }
   0xf   :  { %s1259_s18 = scalar_lea.vmem %s64_s12, 1024  ;;  %p1264_p6 = scmp.lt.s32.totalorder %s64_s12, %s64_s12 }
  0x10   :  { %p1260_p5 = scmp.ne.s32.totalorder %s64_s12, %s1259_s18  ;;  %p1265_p7 = scmp.lt.s32.totalorder %s1259_s18, %s1259_s18 }
  0x12   :  { %p1266_p8 = por %p1265_p7, %p1264_p6 }
  0x14   :  { %p1267_p9 = pnand %p1266_p8, %p1260_p5 }
  0x16   :  { %1270 = shalt.err (!%p1267_p9)
}
  0x17   :  { %69 = dma.hbm_to_vmem [thread:$0]  %s1469_s5, 1024, %s64_s12, [#allocation9], %s1361_s14, %s1361_s14, %s1362_s15  }
  0x18   :  { %s1363_s21 = smov [#allocation2]   ;;  %s1364_s23 = smov [#allocation7]  }
  0x19   :  { %s23_s22 = sshll.u32 %s1363_s21, 4  ;;  %s49_s24 = sshll.u32 %s1364_s23, 4  ;;  %s24_s22 = int_to_ptr.vmem [resolvable:$true] %s23_s22  ;;  %s50_s24 = int_to_ptr.vmem [resolvable:$true] %s49_s24 }
  0x1a   :  { %s1279_s1 = scalar_lea.vmem %s24_s22, 1024  ;;  %p1284_p11 = scmp.lt.s32.totalorder %s24_s22, %s24_s22 }
  0x1b   :  { %p1280_p10 = scmp.ne.s32.totalorder %s24_s22, %s1279_s1  ;;  %p1285_p12 = scmp.lt.s32.totalorder %s1279_s1, %s1279_s1 }
  0x1d   :  { %p1286_p13 = por %p1285_p12, %p1284_p11 }
  0x1f   :  { %p1287_p0 = pnand %p1286_p13, %p1280_p10 }
  0x21   :  { %1290 = shalt.err (!%p1287_p0)
}
  0x22   :  { %29 = dma.hbm_to_vmem [thread:$0]  %s1464_s0, 1024, %s24_s22, [#allocation3], %s1361_s14, %s1361_s14, %s1362_s15  }
  0x23   :  { %s1299_s5 = scalar_lea.vmem %s50_s24, 1024  ;;  %p1304_p2 = scmp.lt.s32.totalorder %s50_s24, %s50_s24 }
  0x24   :  { %p1300_p1 = scmp.ne.s32.totalorder %s50_s24, %s1299_s5  ;;  %p1305_p3 = scmp.lt.s32.totalorder %s1299_s5, %s1299_s5 }
  0x26   :  { %p1306_p4 = por %p1305_p3, %p1304_p2 }
  0x28   :  { %p1307_p5 = pnand %p1306_p4, %p1300_p1 }
  0x2a   :  { %1310 = shalt.err (!%p1307_p5)
}
  0x2b   :  { %55 = dma.hbm_to_vmem [thread:$0]  %s1467_s3, 1024, %s50_s24, [#allocation6], %s1361_s14, %s1361_s14, %s1362_s15  }
  0x2c   :  { %s1365_s29 = smov [#allocation10]  }
  0x2d   :  { %s77_s30 = sshll.u32 %s1365_s29, 4  ;;  %s78_s30 = int_to_ptr.vmem [resolvable:$true] %s77_s30 }
  0x2e   :  { %s1319_s10 = scalar_lea.vmem %s78_s30, 1024  ;;  %p1324_p7 = scmp.lt.s32.totalorder %s78_s30, %s78_s30 }
  0x2f   :  { %p1320_p6 = scmp.ne.s32.totalorder %s78_s30, %s1319_s10  ;;  %p1325_p8 = scmp.lt.s32.totalorder %s1319_s10, %s1319_s10 }
  0x31   :  { %p1326_p9 = por %p1325_p8, %p1324_p7 }
  0x33   :  { %p1327_p10 = pnand %p1326_p9, %p1320_p6 }
  0x35   :  { %1330 = shalt.err (!%p1327_p10)
}
  0x36   :  { %83 = dma.hbm_to_vmem [thread:$0]  %s1471_s7, 1024, %s78_s30, [#allocation9], %s1361_s14, %s1361_s14, %s1362_s15  }
  0x37   :  { %1351 = dma.done.wait [#allocation3], 1024  }
  0x38   :  { %1352 = vsyncadd [#allocation3], 4294966272 }
  0x39   :  { %1353 = dma.done.wait [#allocation6], 2048  }
  0x3a   :  { %1354 = vsyncadd [#allocation6], 4294965248 }
  0x3b   :  { %1355 = dma.done.wait [#allocation9], 2048  }
  0x3c   :  { %1356 = vsyncadd [#allocation9], 4294965248  ;;  %v1191_v0 = vld [vmem:[#allocation5 + $0x38] sm:$0xff]   ;;  %v1192_v1 = vld [vmem:[#allocation5 + $0x30] sm:$0xff]  }
  0x3d   :  { %1053 = vmatprep.subr.bf16.mxu0 %v1191_v0  ;;  %v1193_v2 = vld [vmem:[#allocation5 + $0x28] sm:$0xff]   ;;  %v1194_v3 = vld [vmem:[#allocation5 + $0x20] sm:$0xff]   ;;  %v1195_v5 = vld [vmem:[#allocation5 + $0x18] sm:$0xff]  }
  0x3e   :  { %1054 = vmatpush3.bf16.msra.mxu0 %v1191_v0  ;;  %v1199_v4 = vld [vmem:[#allocation2] sm:$0xff]   ;;  %v1196_v6 = vld [vmem:[#allocation5 + $0x10] sm:$0xff]   ;;  %v1207_v7 = vld [vmem:[#allocation7 + $0x38] sm:$0xff]  }
  0x3f   :  { %1055 = vmatprep.subr.bf16.mxu0 %v1192_v1  ;;  %1069 = vmatprep.mubr.bf16.mxu0 %v1199_v4  ;;  %v1208_v8 = vld [vmem:[#allocation7 + $0x30] sm:$0xff]   ;;  %v1197_v9 = vld [vmem:[#allocation5 + $0x8] sm:$0xff]   ;;  %v1198_v11 = vld [vmem:[#allocation5] sm:$0xff]  }
  0x40   :  { %1085 = vmatprep.subr.bf16.mxu1 %v1207_v7  ;;  %v1209_v10 = vld [vmem:[#allocation7 + $0x28] sm:$0xff]   ;;  %v1210_v12 = vld [vmem:[#allocation7 + $0x20] sm:$0xff]   ;;  %v1211_v13 = vld [vmem:[#allocation7 + $0x18] sm:$0xff]  }
  0x41   :  { %1086 = vmatpush3.bf16.msra.mxu1 %v1207_v7  ;;  %v1200_v14 = vld [vmem:[#allocation2 + $0x8] sm:$0xff]   ;;  %v1201_v15 = vld [vmem:[#allocation2 + $0x10] sm:$0xff]   ;;  %v1202_v16 = vld [vmem:[#allocation2 + $0x18] sm:$0xff]  }
  0x42   :  { %1056 = vmatpush3.bf16.msra.mxu0 %v1192_v1  ;;  %1087 = vmatprep.subr.bf16.mxu1 %v1208_v8  ;;  %v1203_v17 = vld [vmem:[#allocation2 + $0x20] sm:$0xff]   ;;  %v1204_v18 = vld [vmem:[#allocation2 + $0x28] sm:$0xff]   ;;  %v1205_v19 = vld [vmem:[#allocation2 + $0x30] sm:$0xff]  }
  0x43   :  { %1057 = vmatprep.subr.bf16.mxu0 %v1193_v2  ;;  %v1206_v20 = vld [vmem:[#allocation2 + $0x38] sm:$0xff]   ;;  %v1212_v21 = vld [vmem:[#allocation7 + $0x10] sm:$0xff]   ;;  %v1213_v22 = vld [vmem:[#allocation7 + $0x8] sm:$0xff]  }
  0x44   :  { %v1214_v23 = vld [vmem:[#allocation7] sm:$0xff]   ;;  %v1215_v24 = vld [vmem:[#allocation8 + $0x38] sm:$0xff]   ;;  %v1216_v25 = vld [vmem:[#allocation8 + $0x30] sm:$0xff]  }
  0x45   :  { %1088 = vmatpush3.bf16.msra.mxu1 %v1208_v8  ;;  %v1217_v26 = vld [vmem:[#allocation8 + $0x28] sm:$0xff]   ;;  %v1218_v27 = vld [vmem:[#allocation8 + $0x20] sm:$0xff]   ;;  %v1219_v28 = vld [vmem:[#allocation8 + $0x18] sm:$0xff]  }
  0x46   :  { %1058 = vmatpush3.bf16.msra.mxu0 %v1193_v2  ;;  %1089 = vmatprep.subr.bf16.mxu1 %v1209_v10  ;;  %v945_v31 = vld [vmem:[%s1466_s2] ss:$0 sm:$0xff] }
  0x47   :  { %1059 = vmatprep.subr.bf16.mxu0 %v1194_v3 }
  0x49   :  { %1090 = vmatpush3.bf16.msra.mxu1 %v1209_v10 }
  0x4a   :  { %1060 = vmatpush3.bf16.msra.mxu0 %v1194_v3  ;;  %1091 = vmatprep.subr.bf16.mxu1 %v1210_v12 }
  0x4b   :  { %1061 = vmatprep.subr.bf16.mxu0 %v1195_v5 }
  0x4d   :  { %1092 = vmatpush3.bf16.msra.mxu1 %v1210_v12 }
  0x4e   :  { %1062 = vmatpush3.bf16.msra.mxu0 %v1195_v5  ;;  %1093 = vmatprep.subr.bf16.mxu1 %v1211_v13 }
  0x4f   :  { %1063 = vmatprep.subr.bf16.mxu0 %v1196_v6 }
  0x51   :  { %1094 = vmatpush3.bf16.msra.mxu1 %v1211_v13 }
  0x52   :  { %1064 = vmatpush3.bf16.msra.mxu0 %v1196_v6  ;;  %1095 = vmatprep.subr.bf16.mxu1 %v1212_v21 }
  0x53   :  { %1065 = vmatprep.subr.bf16.mxu0 %v1197_v9 }
  0x55   :  { %1096 = vmatpush3.bf16.msra.mxu1 %v1212_v21 }
  0x56   :  { %1066 = vmatpush3.bf16.msra.mxu0 %v1197_v9  ;;  %1097 = vmatprep.subr.bf16.mxu1 %v1213_v22 }
  0x57   :  { %1067 = vmatprep.subr.bf16.mxu0 %v1198_v11 }
  0x59   :  { %1098 = vmatpush3.bf16.msra.mxu1 %v1213_v22  ;;  %v1220_v22 = vld [vmem:[#allocation8 + $0x10] sm:$0xff]  }
  0x5a   :  { %1068 = vmatpush3.bf16.msra.mxu0 %v1198_v11  ;;  %1099 = vmatprep.subr.bf16.mxu1 %v1214_v23 }
  0x5b   :  { %1117 = vmatprep.subr.bf16.mxu0 %v1215_v24 }
  0x5d   :  { %1070 = vmatmul.mubr.bf16.vlgmr.msra.gmra.mxu0 %v1200_v14  ;;  %1100 = vmatpush3.bf16.msra.mxu1 %v1214_v23  ;;  %v1221_v23 = vld [vmem:[#allocation8 + $0x8] sm:$0xff]  }
  0x5e   :  { %1073 = vmatprep.mubr.bf16.mxu0 %v1201_v15  ;;  %1118 = vmatpush3.bf16.msra.mxu0 %v1215_v24  ;;  %v1222_v24 = vld [vmem:[#allocation8] sm:$0xff]  }
  0x5f   :  { %1119 = vmatprep.subr.bf16.mxu0 %v1216_v25 }
  0x62   :  { %1120 = vmatpush3.bf16.msra.mxu0 %v1216_v25  ;;  %v1223_v25 = vld [vmem:[#allocation10 + $0x38] sm:$0xff]  }
  0x63   :  { %1121 = vmatprep.subr.bf16.mxu0 %v1217_v26  ;;  %1149 = vmatprep.subr.bf16.mxu1 %v1223_v25 }
  0x65   :  { %1074 = vmatmul.mubr.bf16.gmra.mxu0 %v1202_v16 }
  0x66   :  { %1077 = vmatprep.mubr.bf16.mxu0 %v1203_v17  ;;  %1122 = vmatpush3.bf16.msra.mxu0 %v1217_v26  ;;  %v1224_v26 = vld [vmem:[#allocation10 + $0x30] sm:$0xff]  }
  0x67   :  { %1123 = vmatprep.subr.bf16.mxu0 %v1218_v27 }
  0x6a   :  { %1124 = vmatpush3.bf16.msra.mxu0 %v1218_v27  ;;  %v1225_v27 = vld [vmem:[#allocation10 + $0x28] sm:$0xff]  }
  0x6b   :  { %1125 = vmatprep.subr.bf16.mxu0 %v1219_v28 }
  0x6d   :  { %1078 = vmatmul.mubr.bf16.gmra.mxu0 %v1204_v18 }
  0x6e   :  { %1081 = vmatprep.mubr.bf16.mxu0 %v1205_v19  ;;  %1126 = vmatpush3.bf16.msra.mxu0 %v1219_v28  ;;  %v1226_v28 = vld [vmem:[#allocation10 + $0x20] sm:$0xff]  }
  0x6f   :  { %1127 = vmatprep.subr.bf16.mxu0 %v1220_v22 }
  0x72   :  { %1128 = vmatpush3.bf16.msra.mxu0 %v1220_v22 }
  0x73   :  { %1129 = vmatprep.subr.bf16.mxu0 %v1221_v23 }
  0x75   :  { %1082 = vmatmul.mubr.bf16.gmra.mxu0 %v1206_v20 }
  0x76   :  { %1130 = vmatpush3.bf16.msra.mxu0 %v1221_v23  ;;  %v1228_v23 = vld [vmem:[#allocation10 + $0x10] sm:$0xff]  }
  0x77   :  { %1131 = vmatprep.subr.bf16.mxu0 %v1222_v24 }
  0x7a   :  { %1132 = vmatpush3.bf16.msra.mxu0 %v1222_v24  ;;  %v1229_v24 = vld [vmem:[#allocation10 + $0x8] sm:$0xff]  }
 0x11d   :  { %v1071_v29 = vpop.f32.mrf.mxu0 }
 0x11e   :  { %v280_v35 = vadd.f32 %v1071_v29, %v945_v31  ;;  %v1227_v29 = vld [vmem:[#allocation10 + $0x18] sm:$0xff]  }
 0x11f   :  { %v271_v30 = vpop.f32.mrf.mxu0 }
 0x120   :  { %v272_v33 = vadd.f32 %v945_v31, %v271_v30  ;;  %v336_v42 = vmax.f32 %v280_v35, 0.0 }
 0x121   :  { %v1072_v32 = vpop.f32.mrf.mxu0 }
 0x122   :  { %v283_v34 = vadd.f32 %v1072_v32, %v945_v31  ;;  %v334_v40 = vmax.f32 %v272_v33, 0.0  ;;  %v962_v32 = vld [vmem:[%s1468_s4] ss:$0 sm:$0xff] }
 0x123   :  { %v274_v36 = vpop.f32.mrf.mxu0 }
 0x124   :  { %v275_v37 = vadd.f32 %v945_v31, %v274_v36  ;;  %v337_v38 = vmax.f32 %v283_v34, 0.0 }
 0x125   :  { %v1075_v39 = vpop.f32.mrf.mxu0 }
 0x126   :  { %v335_v41 = vmax.f32 %v275_v37, 0.0  ;;  %v351_v45 = vpack.c.bf16 %v337_v38, %v336_v42  ;;  %v296_v49 = vadd.f32 %v1075_v39, %v945_v31 }
 0x127   :  { %v287_v43 = vpop.f32.mrf.mxu0 }
 0x128   :  { %v350_v44 = vpack.c.bf16 %v335_v41, %v334_v40  ;;  %v288_v47 = vadd.f32 %v945_v31, %v287_v43  ;;  %v340_v56 = vmax.f32 %v296_v49, 0.0 }
 0x129   :  { %v1076_v46 = vpop.f32.mrf.mxu0 }
 0x12a   :  { %v299_v48 = vadd.f32 %v1076_v46, %v945_v31  ;;  %1101 = vmatprep.mubr.bf16.mxu1 %v350_v44  ;;  %v338_v54 = vmax.f32 %v288_v47, 0.0 }
 0x12b   :  { %v290_v50 = vpop.f32.mrf.mxu0  ;;  %1102 = vmatmul.mubr.bf16.vlgmr.msra.gmra.mxu1 %v351_v45 }
 0x12c   :  { %v291_v51 = vadd.f32 %v945_v31, %v290_v50  ;;  %v341_v52 = vmax.f32 %v299_v48, 0.0  ;;  %1150 = vmatpush3.bf16.msra.mxu1 %v1223_v25  ;;  %v1230_v25 = vld [vmem:[#allocation10] sm:$0xff]  }
 0x12d   :  { %v1079_v53 = vpop.f32.mrf.mxu0  ;;  %1151 = vmatprep.subr.bf16.mxu1 %v1224_v26 }
 0x12e   :  { %v339_v55 = vmax.f32 %v291_v51, 0.0  ;;  %v353_v59 = vpack.c.bf16 %v341_v52, %v340_v56  ;;  %v312_v63 = vadd.f32 %v1079_v53, %v945_v31 }
 0x12f   :  { %v303_v57 = vpop.f32.mrf.mxu0 }
 0x130   :  { %v352_v58 = vpack.c.bf16 %v339_v55, %v338_v54  ;;  %v304_v61 = vadd.f32 %v945_v31, %v303_v57  ;;  %v344_v6 = vmax.f32 %v312_v63, 0.0  ;;  %1152 = vmatpush3.bf16.msra.mxu1 %v1224_v26 }
 0x131   :  { %v1080_v60 = vpop.f32.mrf.mxu0  ;;  %1153 = vmatprep.subr.bf16.mxu1 %v1225_v27 }
 0x132   :  { %v315_v62 = vadd.f32 %v1080_v60, %v945_v31  ;;  %1105 = vmatprep.mubr.bf16.mxu1 %v352_v58  ;;  %v342_v4 = vmax.f32 %v304_v61, 0.0 }
 0x133   :  { %v306_v0 = vpop.f32.mrf.mxu0  ;;  %1106 = vmatmul.mubr.bf16.gmra.mxu1 %v353_v59 }
 0x134   :  { %v307_v1 = vadd.f32 %v945_v31, %v306_v0  ;;  %v345_v2 = vmax.f32 %v315_v62, 0.0  ;;  %1154 = vmatpush3.bf16.msra.mxu1 %v1225_v27 }
 0x135   :  { %v1083_v3 = vpop.f32.mrf.mxu0  ;;  %1155 = vmatprep.subr.bf16.mxu1 %v1226_v28 }
 0x136   :  { %v343_v5 = vmax.f32 %v307_v1, 0.0  ;;  %v355_v9 = vpack.c.bf16 %v345_v2, %v344_v6  ;;  %v328_v13 = vadd.f32 %v1083_v3, %v945_v31 }
 0x137   :  { %v319_v7 = vpop.f32.mrf.mxu0 }
 0x138   :  { %v354_v8 = vpack.c.bf16 %v343_v5, %v342_v4  ;;  %v320_v11 = vadd.f32 %v945_v31, %v319_v7  ;;  %v348_v19 = vmax.f32 %v328_v13, 0.0  ;;  %1156 = vmatpush3.bf16.msra.mxu1 %v1226_v28  ;;  %v971_v28 = vld [vmem:[%s1470_s6] ss:$0 sm:$0xff] }
 0x139   :  { %v1084_v10 = vpop.f32.mrf.mxu0  ;;  %1157 = vmatprep.subr.bf16.mxu1 %v1227_v29 }
 0x13a   :  { %v331_v12 = vadd.f32 %v1084_v10, %v945_v31  ;;  %1109 = vmatprep.mubr.bf16.mxu1 %v354_v8  ;;  %v346_v17 = vmax.f32 %v320_v11, 0.0 }
 0x13b   :  { %v322_v14 = vpop.f32.mrf.mxu0  ;;  %1110 = vmatmul.mubr.bf16.gmra.mxu1 %v355_v9 }
 0x13c   :  { %v323_v15 = vadd.f32 %v945_v31, %v322_v14  ;;  %v349_v16 = vmax.f32 %v331_v12, 0.0  ;;  %1158 = vmatpush3.bf16.msra.mxu1 %v1227_v29 }
 0x13d   :  { %1159 = vmatprep.subr.bf16.mxu1 %v1228_v23 }
 0x13e   :  { %v347_v18 = vmax.f32 %v323_v15, 0.0  ;;  %v357_v21 = vpack.c.bf16 %v349_v16, %v348_v19 }
 0x140   :  { %v356_v20 = vpack.c.bf16 %v347_v18, %v346_v17  ;;  %1160 = vmatpush3.bf16.msra.mxu1 %v1228_v23 }
 0x141   :  { %1161 = vmatprep.subr.bf16.mxu1 %v1229_v24 }
 0x142   :  { %1113 = vmatprep.mubr.bf16.mxu1 %v356_v20 }
 0x143   :  { %1114 = vmatmul.mubr.bf16.gmra.mxu1 %v357_v21 }
 0x144   :  { %1162 = vmatpush3.bf16.msra.mxu1 %v1229_v24 }
 0x145   :  { %1163 = vmatprep.subr.bf16.mxu1 %v1230_v25 }
 0x148   :  { %1164 = vmatpush3.bf16.msra.mxu1 %v1230_v25 }
 0x1eb   :  { %v1103_v30 = vpop.f32.mrf.mxu1 }
 0x1ec   :  { %v472_v36 = vadd.f32 %v1103_v30, %v962_v32 }
 0x1ed   :  { %v463_v31 = vpop.f32.mrf.mxu1 }
 0x1ee   :  { %v464_v34 = vadd.f32 %v962_v32, %v463_v31  ;;  %v528_v43 = vmax.f32 %v472_v36, 0.0 }
 0x1ef   :  { %v1104_v33 = vpop.f32.mrf.mxu1 }
 0x1f0   :  { %v475_v35 = vadd.f32 %v1104_v33, %v962_v32  ;;  %v526_v41 = vmax.f32 %v464_v34, 0.0 }
 0x1f1   :  { %v466_v37 = vpop.f32.mrf.mxu1 }
 0x1f2   :  { %v467_v38 = vadd.f32 %v962_v32, %v466_v37  ;;  %v529_v39 = vmax.f32 %v475_v35, 0.0 }
 0x1f3   :  { %v1107_v40 = vpop.f32.mrf.mxu1 }
 0x1f4   :  { %v527_v42 = vmax.f32 %v467_v38, 0.0  ;;  %v543_v46 = vpack.c.bf16 %v529_v39, %v528_v43  ;;  %v488_v50 = vadd.f32 %v1107_v40, %v962_v32 }
 0x1f5   :  { %v479_v44 = vpop.f32.mrf.mxu1 }
 0x1f6   :  { %v542_v45 = vpack.c.bf16 %v527_v42, %v526_v41  ;;  %v480_v48 = vadd.f32 %v962_v32, %v479_v44  ;;  %v532_v57 = vmax.f32 %v488_v50, 0.0 }
 0x1f7   :  { %v1108_v47 = vpop.f32.mrf.mxu1 }
 0x1f8   :  { %v491_v49 = vadd.f32 %v1108_v47, %v962_v32  ;;  %1133 = vmatprep.mubr.bf16.mxu0 %v542_v45  ;;  %v530_v55 = vmax.f32 %v480_v48, 0.0 }
 0x1f9   :  { %v482_v51 = vpop.f32.mrf.mxu1  ;;  %1134 = vmatmul.mubr.bf16.vlgmr.msra.gmra.mxu0 %v543_v46 }
 0x1fa   :  { %v483_v52 = vadd.f32 %v962_v32, %v482_v51  ;;  %v533_v53 = vmax.f32 %v491_v49, 0.0 }
 0x1fb   :  { %v1111_v54 = vpop.f32.mrf.mxu1 }
 0x1fc   :  { %v531_v56 = vmax.f32 %v483_v52, 0.0  ;;  %v545_v60 = vpack.c.bf16 %v533_v53, %v532_v57  ;;  %v504_v0 = vadd.f32 %v1111_v54, %v962_v32 }
 0x1fd   :  { %v495_v58 = vpop.f32.mrf.mxu1 }
 0x1fe   :  { %v544_v59 = vpack.c.bf16 %v531_v56, %v530_v55  ;;  %v496_v62 = vadd.f32 %v962_v32, %v495_v58  ;;  %v536_v7 = vmax.f32 %v504_v0, 0.0 }
 0x1ff   :  { %v1112_v61 = vpop.f32.mrf.mxu1 }
 0x200   :  { %v507_v63 = vadd.f32 %v1112_v61, %v962_v32  ;;  %1137 = vmatprep.mubr.bf16.mxu0 %v544_v59  ;;  %v534_v5 = vmax.f32 %v496_v62, 0.0 }
 0x201   :  { %v498_v1 = vpop.f32.mrf.mxu1  ;;  %1138 = vmatmul.mubr.bf16.gmra.mxu0 %v545_v60 }
 0x202   :  { %v499_v2 = vadd.f32 %v962_v32, %v498_v1  ;;  %v537_v3 = vmax.f32 %v507_v63, 0.0 }
 0x203   :  { %v1115_v4 = vpop.f32.mrf.mxu1 }
 0x204   :  { %v535_v6 = vmax.f32 %v499_v2, 0.0  ;;  %v547_v10 = vpack.c.bf16 %v537_v3, %v536_v7  ;;  %v520_v14 = vadd.f32 %v1115_v4, %v962_v32 }
 0x205   :  { %v511_v8 = vpop.f32.mrf.mxu1 }
 0x206   :  { %v546_v9 = vpack.c.bf16 %v535_v6, %v534_v5  ;;  %v512_v12 = vadd.f32 %v962_v32, %v511_v8  ;;  %v540_v20 = vmax.f32 %v520_v14, 0.0 }
 0x207   :  { %v1116_v11 = vpop.f32.mrf.mxu1 }
 0x208   :  { %v523_v13 = vadd.f32 %v1116_v11, %v962_v32  ;;  %1141 = vmatprep.mubr.bf16.mxu0 %v546_v9  ;;  %v538_v18 = vmax.f32 %v512_v12, 0.0 }
 0x209   :  { %v514_v15 = vpop.f32.mrf.mxu1  ;;  %1142 = vmatmul.mubr.bf16.gmra.mxu0 %v547_v10 }
 0x20a   :  { %v515_v16 = vadd.f32 %v962_v32, %v514_v15  ;;  %v541_v17 = vmax.f32 %v523_v13, 0.0 }
 0x20c   :  { %v539_v19 = vmax.f32 %v515_v16, 0.0  ;;  %v549_v22 = vpack.c.bf16 %v541_v17, %v540_v20 }
 0x20e   :  { %v548_v21 = vpack.c.bf16 %v539_v19, %v538_v18  ;;  %v980_v19 = vld [vmem:[%s1472_s8] ss:$0 sm:$0xff]  ;;  %s1366_s8 = smov [#allocation11]  }
 0x20f   :  { %s931_s15 = sshll.u32 %s1366_s8, 4  ;;  %s932_s15 = int_to_ptr.vmem [resolvable:$true] %s931_s15 }
 0x210   :  { %1145 = vmatprep.mubr.bf16.mxu0 %v548_v21  ;;  %s1331_s16 = scalar_lea.vmem %s932_s15, 2048  ;;  %p1336_p12 = scmp.lt.s32.totalorder %s932_s15, %s932_s15 }
 0x211   :  { %1146 = vmatmul.mubr.bf16.gmra.mxu0 %v549_v22  ;;  %p1332_p11 = scmp.ne.s32.totalorder %s932_s15, %s1331_s16  ;;  %p1337_p13 = scmp.lt.s32.totalorder %s1331_s16, %s1331_s16 }
 0x213   :  { %p1338_p0 = por %p1337_p13, %p1336_p12 }
 0x215   :  { %p1339_p1 = pnand %p1338_p0, %p1332_p11 }
 0x2b9   :  { %v1135_v26 = vpop.f32.mrf.mxu0 }
 0x2ba   :  { %v664_v32 = vadd.f32 %v1135_v26, %v971_v28 }
 0x2bb   :  { %v655_v27 = vpop.f32.mrf.mxu0 }
 0x2bc   :  { %v656_v30 = vadd.f32 %v971_v28, %v655_v27  ;;  %v720_v39 = vmax.f32 %v664_v32, 0.0 }
 0x2bd   :  { %v1136_v29 = vpop.f32.mrf.mxu0 }
 0x2be   :  { %v667_v31 = vadd.f32 %v1136_v29, %v971_v28  ;;  %v718_v37 = vmax.f32 %v656_v30, 0.0 }
 0x2bf   :  { %v658_v33 = vpop.f32.mrf.mxu0 }
 0x2c0   :  { %v659_v34 = vadd.f32 %v971_v28, %v658_v33  ;;  %v721_v35 = vmax.f32 %v667_v31, 0.0 }
 0x2c1   :  { %v1139_v36 = vpop.f32.mrf.mxu0 }
 0x2c2   :  { %v719_v38 = vmax.f32 %v659_v34, 0.0  ;;  %v735_v42 = vpack.c.bf16 %v721_v35, %v720_v39  ;;  %v680_v46 = vadd.f32 %v1139_v36, %v971_v28 }
 0x2c3   :  { %v671_v40 = vpop.f32.mrf.mxu0 }
 0x2c4   :  { %v734_v41 = vpack.c.bf16 %v719_v38, %v718_v37  ;;  %v672_v44 = vadd.f32 %v971_v28, %v671_v40  ;;  %v724_v53 = vmax.f32 %v680_v46, 0.0 }
 0x2c5   :  { %v1140_v43 = vpop.f32.mrf.mxu0 }
 0x2c6   :  { %v683_v45 = vadd.f32 %v1140_v43, %v971_v28  ;;  %1165 = vmatprep.mubr.bf16.mxu1 %v734_v41  ;;  %v722_v51 = vmax.f32 %v672_v44, 0.0 }
 0x2c7   :  { %v674_v47 = vpop.f32.mrf.mxu0  ;;  %1166 = vmatmul.mubr.bf16.vlgmr.msra.gmra.mxu1 %v735_v42 }
 0x2c8   :  { %v675_v48 = vadd.f32 %v971_v28, %v674_v47  ;;  %v725_v49 = vmax.f32 %v683_v45, 0.0 }
 0x2c9   :  { %v1143_v50 = vpop.f32.mrf.mxu0 }
 0x2ca   :  { %v723_v52 = vmax.f32 %v675_v48, 0.0  ;;  %v737_v56 = vpack.c.bf16 %v725_v49, %v724_v53  ;;  %v696_v60 = vadd.f32 %v1143_v50, %v971_v28 }
 0x2cb   :  { %v687_v54 = vpop.f32.mrf.mxu0 }
 0x2cc   :  { %v736_v55 = vpack.c.bf16 %v723_v52, %v722_v51  ;;  %v688_v58 = vadd.f32 %v971_v28, %v687_v54  ;;  %v728_v3 = vmax.f32 %v696_v60, 0.0 }
 0x2cd   :  { %v1144_v57 = vpop.f32.mrf.mxu0 }
 0x2ce   :  { %v699_v59 = vadd.f32 %v1144_v57, %v971_v28  ;;  %1169 = vmatprep.mubr.bf16.mxu1 %v736_v55  ;;  %v726_v1 = vmax.f32 %v688_v58, 0.0 }
 0x2cf   :  { %v690_v61 = vpop.f32.mrf.mxu0  ;;  %1170 = vmatmul.mubr.bf16.gmra.mxu1 %v737_v56 }
 0x2d0   :  { %v691_v62 = vadd.f32 %v971_v28, %v690_v61  ;;  %v729_v63 = vmax.f32 %v699_v59, 0.0 }
 0x2d1   :  { %v1147_v0 = vpop.f32.mrf.mxu0 }
 0x2d2   :  { %v727_v2 = vmax.f32 %v691_v62, 0.0  ;;  %v739_v6 = vpack.c.bf16 %v729_v63, %v728_v3  ;;  %v712_v10 = vadd.f32 %v1147_v0, %v971_v28 }
 0x2d3   :  { %v703_v4 = vpop.f32.mrf.mxu0 }
 0x2d4   :  { %v738_v5 = vpack.c.bf16 %v727_v2, %v726_v1  ;;  %v704_v8 = vadd.f32 %v971_v28, %v703_v4  ;;  %v732_v16 = vmax.f32 %v712_v10, 0.0 }
 0x2d5   :  { %v1148_v7 = vpop.f32.mrf.mxu0 }
 0x2d6   :  { %v715_v9 = vadd.f32 %v1148_v7, %v971_v28  ;;  %1173 = vmatprep.mubr.bf16.mxu1 %v738_v5  ;;  %v730_v14 = vmax.f32 %v704_v8, 0.0 }
 0x2d7   :  { %v706_v11 = vpop.f32.mrf.mxu0  ;;  %1174 = vmatmul.mubr.bf16.gmra.mxu1 %v739_v6 }
 0x2d8   :  { %v707_v12 = vadd.f32 %v971_v28, %v706_v11  ;;  %v733_v13 = vmax.f32 %v715_v9, 0.0 }
 0x2da   :  { %v731_v15 = vmax.f32 %v707_v12, 0.0  ;;  %v741_v18 = vpack.c.bf16 %v733_v13, %v732_v16 }
 0x2dc   :  { %v740_v17 = vpack.c.bf16 %v731_v15, %v730_v14 }
 0x2de   :  { %1177 = vmatprep.mubr.bf16.mxu1 %v740_v17 }
 0x2df   :  { %1178 = vmatmul.mubr.bf16.gmra.mxu1 %v741_v18 }
 0x387   :  { %v1167_v20 = vpop.f32.mrf.mxu1 }
 0x388   :  { %v856_v21 = vadd.f32 %v1167_v20, %v980_v19 }
 0x389   :  { %v847_v22 = vpop.f32.mrf.mxu1 }
 0x38a   :  { %912 = vst [vmem:[#allocation11 + $0x10] sm:$0xff] %v856_v21  ;;  %v848_v23 = vadd.f32 %v980_v19, %v847_v22 }
 0x38b   :  { %v1168_v24 = vpop.f32.mrf.mxu1 }
 0x38c   :  { %910 = vst [vmem:[#allocation11] sm:$0xff] %v848_v23  ;;  %v859_v25 = vadd.f32 %v1168_v24, %v980_v19 }
 0x38d   :  { %v850_v26 = vpop.f32.mrf.mxu1 }
 0x38e   :  { %913 = vst [vmem:[#allocation11 + $0x18] sm:$0xff] %v859_v25  ;;  %v851_v27 = vadd.f32 %v980_v19, %v850_v26 }
 0x38f   :  { %v1171_v28 = vpop.f32.mrf.mxu1 }
 0x390   :  { %911 = vst [vmem:[#allocation11 + $0x8] sm:$0xff] %v851_v27  ;;  %v872_v29 = vadd.f32 %v1171_v28, %v980_v19 }
 0x391   :  { %v863_v30 = vpop.f32.mrf.mxu1 }
 0x392   :  { %916 = vst [vmem:[#allocation11 + $0x30] sm:$0xff] %v872_v29  ;;  %v864_v31 = vadd.f32 %v980_v19, %v863_v30 }
 0x393   :  { %v1172_v32 = vpop.f32.mrf.mxu1 }
 0x394   :  { %914 = vst [vmem:[#allocation11 + $0x20] sm:$0xff] %v864_v31  ;;  %v875_v33 = vadd.f32 %v1172_v32, %v980_v19 }
 0x395   :  { %v866_v34 = vpop.f32.mrf.mxu1 }
 0x396   :  { %917 = vst [vmem:[#allocation11 + $0x38] sm:$0xff] %v875_v33  ;;  %v867_v35 = vadd.f32 %v980_v19, %v866_v34 }
 0x397   :  { %v1175_v36 = vpop.f32.mrf.mxu1 }
 0x398   :  { %915 = vst [vmem:[#allocation11 + $0x28] sm:$0xff] %v867_v35  ;;  %v888_v37 = vadd.f32 %v1175_v36, %v980_v19 }
 0x399   :  { %v879_v38 = vpop.f32.mrf.mxu1 }
 0x39a   :  { %920 = vst [vmem:[#allocation11 + $0x50] sm:$0xff] %v888_v37  ;;  %v880_v39 = vadd.f32 %v980_v19, %v879_v38 }
 0x39b   :  { %v1176_v40 = vpop.f32.mrf.mxu1 }
 0x39c   :  { %918 = vst [vmem:[#allocation11 + $0x40] sm:$0xff] %v880_v39  ;;  %v891_v41 = vadd.f32 %v1176_v40, %v980_v19 }
 0x39d   :  { %v882_v42 = vpop.f32.mrf.mxu1 }
 0x39e   :  { %921 = vst [vmem:[#allocation11 + $0x58] sm:$0xff] %v891_v41  ;;  %v883_v43 = vadd.f32 %v980_v19, %v882_v42 }
 0x39f   :  { %v1179_v44 = vpop.f32.mrf.mxu1 }
 0x3a0   :  { %919 = vst [vmem:[#allocation11 + $0x48] sm:$0xff] %v883_v43  ;;  %v904_v45 = vadd.f32 %v1179_v44, %v980_v19 }
 0x3a1   :  { %v895_v46 = vpop.f32.mrf.mxu1 }
 0x3a2   :  { %924 = vst [vmem:[#allocation11 + $0x70] sm:$0xff] %v904_v45  ;;  %v896_v47 = vadd.f32 %v980_v19, %v895_v46 }
 0x3a3   :  { %v1180_v48 = vpop.f32.mrf.mxu1 }
 0x3a4   :  { %922 = vst [vmem:[#allocation11 + $0x60] sm:$0xff] %v896_v47  ;;  %v907_v49 = vadd.f32 %v1180_v48, %v980_v19 }
 0x3a5   :  { %v898_v50 = vpop.f32.mrf.mxu1 }
 0x3a6   :  { %925 = vst [vmem:[#allocation11 + $0x78] sm:$0xff] %v907_v49  ;;  %v899_v51 = vadd.f32 %v980_v19, %v898_v50 }
 0x3a8   :  { %923 = vst [vmem:[#allocation11 + $0x68] sm:$0xff] %v899_v51 }
 0x3a9   :  { %1342 = shalt.err (!%p1339_p1)
}
 0x3aa   :  { %s1367_s17 = smov 128   ;;  %s1368_s18 = smov 8  }
 0x3ab   :  { %937 = dma.vmem_to_hbm [thread:$0]  %s932_s15, 2048, %s1473_s9, [#allocation4], %s1367_s17, %s1367_s17, %s1368_s18  }
 0x3ac   :  { %1357 = dma.done.wait [#allocation4], 2048  }
 0x3ad   :  { %1358 = vsyncadd [#allocation4], 4294965248 }
 0x3ae   :  { %941 = vsyncpa [#allocation3], 1 }
 0x3af   :  { %942 = vsyncpa [#allocation6], 1 }
 0x3b0   :  { %943 = vsyncpa [#allocation9], 1 }
 0x3b1   :  { %944 = vsyncpa [#allocation4], 1 }

</bundles_post_ra>
